<compile_context>
chip_gen: v5e
topology: v5e:2x2
jax: 0.10.0
libtpu: 0.0.40
codegen_flags: <defaults>
</compile_context>

<pallas_src>
import functools

import numpy as np
import jax
import jax.numpy as jnp
from jax.experimental import pallas as pl
from jax.experimental.pallas import tpu as pltpu


# --------------------------------------------------------------------------------------
# Host-side constant construction (linear-operator folding of pad+blur+resample)
# --------------------------------------------------------------------------------------
def _blur_matrix(L: int) -> np.ndarray:
    """1-D [1,4,6,4,1]/16 blur with PyTorch 'reflect' boundary as an (L, L) matrix."""
    assert L >= 3, "reflect padding of 2 requires length >= 3"
    w = np.array([1.0, 4.0, 6.0, 4.0, 1.0], dtype=np.float64) / 16.0
    B = np.zeros((L, L), dtype=np.float64)
    for j in range(L):
        for k in range(5):
            i = j + k - 2
            if i < 0:
                i = -i                       # reflect: -1 -> 1, -2 -> 2
            elif i >= L:
                i = 2 * (L - 1) - i          # reflect: L -> L-2, L+1 -> L-3
            B[j, i] += w[k]
    return B.astype(np.float32)


def _level_matrices(h: int, w: int):
    Bh = _blur_matrix(h)
    Bw = _blur_matrix(w)
    Gh = jnp.asarray(Bh[::2, :])                 # (h/2, h)   blur-then-take-even-rows
    GwT = jnp.asarray(Bw[::2, :].T)              # (w, w/2)
    Uh = jnp.asarray(2.0 * Bh[:, ::2])           # (h, h/2)   zero-insert-then-blur (x4 folded)
    UwT = jnp.asarray(2.0 * Bw[:, ::2].T)        # (w/2, w)
    return Gh, GwT, Uh, UwT


# --------------------------------------------------------------------------------------
# Pallas kernel: one pyramid level, one (H, W) image (of input AND target) per grid step
# --------------------------------------------------------------------------------------
def _lap_level_kernel(gh_ref, gwt_ref, uh_ref, uwt_ref, xin_ref, xtg_ref,
                      din_ref, dtg_ref, s_ref):
    x_in = xin_ref[0]                        # (H, W)
    x_tg = xtg_ref[0]                        # (H, W)
    gh = gh_ref[...]                         # (H2, H)
    gwt = gwt_ref[...]                       # (W, W2)
    uh = uh_ref[...]                         # (H, H2)
    uwt = uwt_ref[...]                       # (W2, W)

    def downsample(x):                       # Gaussian blur + ::2 subsample, fused
        t = jnp.dot(x, gwt, preferred_element_type=jnp.float32)      # (H, W2)
        return jnp.dot(gh, t, preferred_element_type=jnp.float32)    # (H2, W2)

    def upsample(d):                         # zero-insert + 4*Gaussian blur, fused
        t = jnp.dot(uh, d, preferred_element_type=jnp.float32)       # (H, W2)
        return jnp.dot(t, uwt, preferred_element_type=jnp.float32)   # (H, W)

    d_in = downsample(x_in)
    d_tg = downsample(x_tg)
    u_in = upsample(d_in)
    u_tg = upsample(d_tg)

    # L1 between the two Laplacian residuals of this level (for this image)
    diff = (x_in - x_tg) - (u_in - u_tg)
    row = jnp.sum(jnp.abs(diff), axis=-1, keepdims=True)             # (H, 1)
    tot = jnp.sum(row, axis=0, keepdims=True)                        # (1, 1)

    din_ref[0] = d_in
    dtg_ref[0] = d_tg
    s_ref[0] = tot


def _lap_level(x_in, x_tg, Gh, GwT, Uh, UwT):
    nc, h, w = x_in.shape
    h2, w2 = Gh.shape[0], GwT.shape[1]

    out_shape = (
        jax.ShapeDtypeStruct((nc, h2, w2), jnp.float32),   # next-level input images
        jax.ShapeDtypeStruct((nc, h2, w2), jnp.float32),   # next-level target images
        jax.ShapeDtypeStruct((nc, 1, 1), jnp.float32),     # per-image |diff| sums
    )
    grid_spec = pltpu.PrefetchScalarGridSpec(
        num_scalar_prefetch=0,
        grid=(nc,),
        in_specs=[
            pl.BlockSpec((h2, h), lambda b: (0, 0)),       # Gh  (shared, stays resident)
            pl.BlockSpec((w, w2), lambda b: (0, 0)),       # GwT
            pl.BlockSpec((h, h2), lambda b: (0, 0)),       # Uh
            pl.BlockSpec((w2, w), lambda b: (0, 0)),       # UwT
            pl.BlockSpec((1, h, w), lambda b: (b, 0, 0)),  # input image b
            pl.BlockSpec((1, h, w), lambda b: (b, 0, 0)),  # target image b
        ],
        out_specs=[
            pl.BlockSpec((1, h2, w2), lambda b: (b, 0, 0)),
            pl.BlockSpec((1, h2, w2), lambda b: (b, 0, 0)),
            pl.BlockSpec((1, 1, 1), lambda b: (b, 0, 0)),
        ],
    )
    d_in, d_tg, sums = pl.pallas_call(
        _lap_level_kernel,
        out_shape=out_shape,
        grid_spec=grid_spec,
        compiler_params=pltpu.CompilerParams(dimension_semantics=("parallel",)),
    )(Gh, GwT, Uh, UwT, x_in, x_tg)
    return d_in, d_tg, jnp.sum(sums)


def lap_loss(inputs, target, *, max_levels=5):
    """LapLoss.forward: sum over pyramid levels of L1(mean) between Laplacian residuals."""
    assert inputs.shape == target.shape
    N, C, H, W = inputs.shape
    nc = N * C
    x_in = inputs.astype(jnp.float32).reshape(nc, H, W)
    x_tg = target.astype(jnp.float32).reshape(nc, H, W)

    total = jnp.float32(0.0)
    h, w = H, W
    for _ in range(max_levels):
        # same validity conditions the PyTorch module needs (reflect pad 2, even dims)
        assert h >= 4 and w >= 4 and h % 2 == 0 and w % 2 == 0, (h, w)
        Gh, GwT, Uh, UwT = _level_matrices(h, w)
        x_in, x_tg, level_sum = _lap_level(x_in, x_tg, Gh, GwT, Uh, UwT)
        total = total + level_sum / jnp.float32(nc * h * w)   # F.l1_loss 'mean'
        h, w = h // 2, w // 2
    return total


# --------------------------------------------------------------------------------------
# Pure-JAX reference mirroring the PyTorch code (depthwise 5x5 conv, reflect pad)
# --------------------------------------------------------------------------------------
def _reference_lap_loss(x, y, max_levels=5):
    x = x.astype(jnp.float32)
    y = y.astype(jnp.float32)
    N, C, H, W = x.shape
    w1 = jnp.array([1.0, 4.0, 6.0, 4.0, 1.0], jnp.float32) / 16.0
    k2 = jnp.outer(w1, w1)                                    # == the /256 kernel
    kern = jnp.broadcast_to(k2, (C, 1, 5, 5))

    def conv_gauss(img, k):
        imgp = jnp.pad(img, ((0, 0), (0, 0), (2, 2), (2, 2)), mode="reflect")
        return jax.lax.conv_general_dilated(
            imgp, k, (1, 1), "VALID",
            dimension_numbers=("NCHW", "OIHW", "NCHW"),
            feature_group_count=C,
            precision=jax.lax.Precision.HIGHEST)

    def upsample(t):
        n, c, h, w = t.shape
        z = jnp.zeros((n, c, 2 * h, 2 * w), t.dtype).at[:, :, ::2, ::2].set(t)
        return conv_gauss(z, 4.0 * kern)

    def pyramid(img):
        cur, pyr = img, []
        for _ in range(max_levels):
            f = conv_gauss(cur, kern)
            d = f[:, :, ::2, ::2]
            u = upsample(d)
            pyr.append(cur - u)
            cur = d
        return pyr

    pa, pb = pyramid(x), pyramid(y)
    return sum(jnp.mean(jnp.abs(a - b)) for a, b in zip(pa, pb))


if __name__ == "__main__":
    key = jax.random.PRNGKey(0)
    k1, k2 = jax.random.split(key)
    # Module defaults: max_levels=5, channels=3.  H=W=64 is the smallest spatial size
    # for which 5 pyramid levels are valid (reflect pad 2 needs >= 4 at the last level).
    N, C, H, W = 2, 3, 64, 64
    images = jax.random.normal(k1, (N, C, H, W), dtype=jnp.float32)
    target = jax.random.normal(k2, (N, C, H, W), dtype=jnp.float32)

    loss_fn = jax.jit(functools.partial(lap_loss, max_levels=5))
    loss = jax.block_until_ready(loss_fn(images, target))
    ref = jax.block_until_ready(_reference_lap_loss(images, target, max_levels=5))

    assert jnp.isfinite(loss), "loss is not finite"
    assert jnp.allclose(loss, ref, rtol=1e-3, atol=1e-3), (loss, ref)
    print("KERNEL_OK")
</pallas_src>

<mosaic_0001>
module attributes {stable_mosaic.version = 11 : i64} {
  func.func @_lap_level_kernel(%arg0: i32, %arg1: memref<8x16xf32, #tpu.memory_space<vmem>>, %arg2: memref<16x8xf32, #tpu.memory_space<vmem>>, %arg3: memref<16x8xf32, #tpu.memory_space<vmem>>, %arg4: memref<8x16xf32, #tpu.memory_space<vmem>>, %arg5: memref<1x16x16xf32, #tpu.memory_space<vmem>>, %arg6: memref<1x16x16xf32, #tpu.memory_space<vmem>>, %arg7: memref<1x8x8xf32, #tpu.memory_space<vmem>>, %arg8: memref<1x8x8xf32, #tpu.memory_space<vmem>>, %arg9: memref<1x1x1xf32, #tpu.memory_space<vmem>>) attributes {dimension_semantics = [#tpu.dimension_semantics<parallel>], iteration_bounds = array<i64: 6>, scalar_prefetch = 0 : i64, scratch_operands = 0 : i64, tpu.core_type = #tpu.core_type<tc>, window_params = [{pipeline_mode = #tpu.pipeline_mode<synchronous>, transform_indices = @transform_0, window_bounds = array<i64: 8, 16>}, {pipeline_mode = #tpu.pipeline_mode<synchronous>, transform_indices = @transform_1, window_bounds = array<i64: 16, 8>}, {pipeline_mode = #tpu.pipeline_mode<synchronous>, transform_indices = @transform_2, window_bounds = array<i64: 16, 8>}, {pipeline_mode = #tpu.pipeline_mode<synchronous>, transform_indices = @transform_3, window_bounds = array<i64: 8, 16>}, {transform_indices = @transform_4, window_bounds = array<i64: 1, 16, 16>}, {transform_indices = @transform_5, window_bounds = array<i64: 1, 16, 16>}, {transform_indices = @transform_6, window_bounds = array<i64: 1, 8, 8>}, {transform_indices = @transform_7, window_bounds = array<i64: 1, 8, 8>}, {transform_indices = @transform_8, window_bounds = array<i64: 1, 1, 1>}]} {
    %c0 = arith.constant 0 : index
    %c0_0 = arith.constant 0 : index
    %c0_1 = arith.constant 0 : index
    %0 = vector.load %arg5[%c0, %c0_0, %c0_1] : memref<1x16x16xf32, #tpu.memory_space<vmem>>, vector<1x16x16xf32>
    %1 = vector.shape_cast %0 : vector<1x16x16xf32> to vector<16x16xf32>
    %c0_2 = arith.constant 0 : index
    %c0_3 = arith.constant 0 : index
    %c0_4 = arith.constant 0 : index
    %2 = vector.load %arg6[%c0_2, %c0_3, %c0_4] : memref<1x16x16xf32, #tpu.memory_space<vmem>>, vector<1x16x16xf32>
    %3 = vector.shape_cast %2 : vector<1x16x16xf32> to vector<16x16xf32>
    %c0_5 = arith.constant 0 : index
    %c0_6 = arith.constant 0 : index
    %4 = vector.load %arg1[%c0_5, %c0_6] : memref<8x16xf32, #tpu.memory_space<vmem>>, vector<8x16xf32>
    %c0_7 = arith.constant 0 : index
    %c0_8 = arith.constant 0 : index
    %5 = vector.load %arg2[%c0_7, %c0_8] : memref<16x8xf32, #tpu.memory_space<vmem>>, vector<16x8xf32>
    %c0_9 = arith.constant 0 : index
    %c0_10 = arith.constant 0 : index
    %6 = vector.load %arg3[%c0_9, %c0_10] : memref<16x8xf32, #tpu.memory_space<vmem>>, vector<16x8xf32>
    %c0_11 = arith.constant 0 : index
    %c0_12 = arith.constant 0 : index
    %7 = vector.load %arg4[%c0_11, %c0_12] : memref<8x16xf32, #tpu.memory_space<vmem>>, vector<8x16xf32>
    %cst = arith.constant dense<0.000000e+00> : vector<16x8xf32>
    %8 = tpu.matmul %1, %5, %cst {dimension_numbers = #tpu.dot_dimension_numbers<[1], [0], [0], [1], [0, 0, 1, 1], [], []>} : vector<16x16xf32>, vector<16x8xf32>, vector<16x8xf32> -> vector<16x8xf32>
    %cst_13 = arith.constant dense<0.000000e+00> : vector<8x8xf32>
    %9 = tpu.matmul %4, %8, %cst_13 {dimension_numbers = #tpu.dot_dimension_numbers<[1], [0], [0], [1], [0, 0, 1, 1], [], []>} : vector<8x16xf32>, vector<16x8xf32>, vector<8x8xf32> -> vector<8x8xf32>
    %cst_14 = arith.constant dense<0.000000e+00> : vector<16x8xf32>
    %10 = tpu.matmul %3, %5, %cst_14 {dimension_numbers = #tpu.dot_dimension_numbers<[1], [0], [0], [1], [0, 0, 1, 1], [], []>} : vector<16x16xf32>, vector<16x8xf32>, vector<16x8xf32> -> vector<16x8xf32>
    %cst_15 = arith.constant dense<0.000000e+00> : vector<8x8xf32>
    %11 = tpu.matmul %4, %10, %cst_15 {dimension_numbers = #tpu.dot_dimension_numbers<[1], [0], [0], [1], [0, 0, 1, 1], [], []>} : vector<8x16xf32>, vector<16x8xf32>, vector<8x8xf32> -> vector<8x8xf32>
    %cst_16 = arith.constant dense<0.000000e+00> : vector<16x8xf32>
    %12 = tpu.matmul %6, %9, %cst_16 {dimension_numbers = #tpu.dot_dimension_numbers<[1], [0], [0], [1], [0, 0, 1, 1], [], []>} : vector<16x8xf32>, vector<8x8xf32>, vector<16x8xf32> -> vector<16x8xf32>
    %cst_17 = arith.constant dense<0.000000e+00> : vector<16x16xf32>
    %13 = tpu.matmul %12, %7, %cst_17 {dimension_numbers = #tpu.dot_dimension_numbers<[1], [0], [0], [1], [0, 0, 1, 1], [], []>} : vector<16x8xf32>, vector<8x16xf32>, vector<16x16xf32> -> vector<16x16xf32>
    %cst_18 = arith.constant dense<0.000000e+00> : vector<16x8xf32>
    %14 = tpu.matmul %6, %11, %cst_18 {dimension_numbers = #tpu.dot_dimension_numbers<[1], [0], [0], [1], [0, 0, 1, 1], [], []>} : vector<16x8xf32>, vector<8x8xf32>, vector<16x8xf32> -> vector<16x8xf32>
    %cst_19 = arith.constant dense<0.000000e+00> : vector<16x16xf32>
    %15 = tpu.matmul %14, %7, %cst_19 {dimension_numbers = #tpu.dot_dimension_numbers<[1], [0], [0], [1], [0, 0, 1, 1], [], []>} : vector<16x8xf32>, vector<8x16xf32>, vector<16x16xf32> -> vector<16x16xf32>
    %16 = arith.subf %1, %3 : vector<16x16xf32>
    %17 = arith.subf %13, %15 : vector<16x16xf32>
    %18 = arith.subf %16, %17 : vector<16x16xf32>
    %19 = math.absf %18 : vector<16x16xf32>
    %cst_20 = arith.constant dense<0.000000e+00> : vector<16xf32>
    %20 = vector.multi_reduction <add>, %19, %cst_20 [1] : vector<16x16xf32> to vector<16xf32>
    %21 = vector.shape_cast %20 : vector<16xf32> to vector<16x1xf32>
    %cst_21 = arith.constant dense<0.000000e+00> : vector<1xf32>
    %22 = vector.multi_reduction <add>, %21, %cst_21 [0] : vector<16x1xf32> to vector<1xf32>
    %23 = vector.shape_cast %22 : vector<1xf32> to vector<1x1xf32>
    %c0_22 = arith.constant 0 : index
    %c0_23 = arith.constant 0 : index
    %c0_24 = arith.constant 0 : index
    %24 = vector.load %arg7[%c0_22, %c0_23, %c0_24] : memref<1x8x8xf32, #tpu.memory_space<vmem>>, vector<1x8x8xf32>
    %25 = vector.shape_cast %24 : vector<1x8x8xf32> to vector<8x8xf32>
    %26 = vector.shape_cast %9 : vector<8x8xf32> to vector<1x8x8xf32>
    tpu.vector_store %arg7[%c0_22, %c0_23, %c0_24], %26 {strides = array<i32>} : memref<1x8x8xf32, #tpu.memory_space<vmem>>, vector<1x8x8xf32>,
    %c0_25 = arith.constant 0 : index
    %c0_26 = arith.constant 0 : index
    %c0_27 = arith.constant 0 : index
    %27 = vector.load %arg8[%c0_25, %c0_26, %c0_27] : memref<1x8x8xf32, #tpu.memory_space<vmem>>, vector<1x8x8xf32>
    %28 = vector.shape_cast %27 : vector<1x8x8xf32> to vector<8x8xf32>
    %29 = vector.shape_cast %11 : vector<8x8xf32> to vector<1x8x8xf32>
    tpu.vector_store %arg8[%c0_25, %c0_26, %c0_27], %29 {strides = array<i32>} : memref<1x8x8xf32, #tpu.memory_space<vmem>>, vector<1x8x8xf32>,
    %c0_28 = arith.constant 0 : index
    %c0_29 = arith.constant 0 : index
    %c0_30 = arith.constant 0 : index
    %30 = vector.load %arg9[%c0_28, %c0_29, %c0_30] : memref<1x1x1xf32, #tpu.memory_space<vmem>>, vector<1x1x1xf32>
    %31 = vector.shape_cast %30 : vector<1x1x1xf32> to vector<1x1xf32>
    %32 = vector.shape_cast %23 : vector<1x1xf32> to vector<1x1x1xf32>
    tpu.vector_store %arg9[%c0_28, %c0_29, %c0_30], %32 {strides = array<i32>} : memref<1x1x1xf32, #tpu.memory_space<vmem>>, vector<1x1x1xf32>,
    return
  }
  func.func @transform_0(%arg0: i32) -> (i32, i32) {
    %c0_i32 = arith.constant 0 : i32
    %c0_i32_0 = arith.constant 0 : i32
    %c0_i32_1 = arith.constant 0 : i32
    return %c0_i32, %c0_i32_0 : i32, i32
  }
  func.func @transform_1(%arg0: i32) -> (i32, i32) {
    %c0_i32 = arith.constant 0 : i32
    %c0_i32_0 = arith.constant 0 : i32
    %c0_i32_1 = arith.constant 0 : i32
    return %c0_i32, %c0_i32_0 : i32, i32
  }
  func.func @transform_2(%arg0: i32) -> (i32, i32) {
    %c0_i32 = arith.constant 0 : i32
    %c0_i32_0 = arith.constant 0 : i32
    %c0_i32_1 = arith.constant 0 : i32
    return %c0_i32, %c0_i32_0 : i32, i32
  }
  func.func @transform_3(%arg0: i32) -> (i32, i32) {
    %c0_i32 = arith.constant 0 : i32
    %c0_i32_0 = arith.constant 0 : i32
    %c0_i32_1 = arith.constant 0 : i32
    return %c0_i32, %c0_i32_0 : i32, i32
  }
  func.func @transform_4(%arg0: i32) -> (i32, i32, i32) {
    %c0_i32 = arith.constant 0 : i32
    %c0_i32_0 = arith.constant 0 : i32
    %c0_i32_1 = arith.constant 0 : i32
    return %arg0, %c0_i32, %c0_i32_0 : i32, i32, i32
  }
  func.func @transform_5(%arg0: i32) -> (i32, i32, i32) {
    %c0_i32 = arith.constant 0 : i32
    %c0_i32_0 = arith.constant 0 : i32
    %c0_i32_1 = arith.constant 0 : i32
    return %arg0, %c0_i32, %c0_i32_0 : i32, i32, i32
  }
  func.func @transform_6(%arg0: i32) -> (i32, i32, i32) {
    %c0_i32 = arith.constant 0 : i32
    %c0_i32_0 = arith.constant 0 : i32
    %c0_i32_1 = arith.constant 0 : i32
    return %arg0, %c0_i32, %c0_i32_0 : i32, i32, i32
  }
  func.func @transform_7(%arg0: i32) -> (i32, i32, i32) {
    %c0_i32 = arith.constant 0 : i32
    %c0_i32_0 = arith.constant 0 : i32
    %c0_i32_1 = arith.constant 0 : i32
    return %arg0, %c0_i32, %c0_i32_0 : i32, i32, i32
  }
  func.func @transform_8(%arg0: i32) -> (i32, i32, i32) {
    %c0_i32 = arith.constant 0 : i32
    %c0_i32_0 = arith.constant 0 : i32
    %c0_i32_1 = arith.constant 0 : i32
    return %arg0, %c0_i32, %c0_i32_0 : i32, i32, i32
  }
}

module attributes {stable_mosaic.version = 11 : i64} {
  func.func @_lap_level_kernel(%arg0: i32, %arg1: memref<16x32xf32, #tpu.memory_space<vmem>>, %arg2: memref<32x16xf32, #tpu.memory_space<vmem>>, %arg3: memref<32x16xf32, #tpu.memory_space<vmem>>, %arg4: memref<16x32xf32, #tpu.memory_space<vmem>>, %arg5: memref<1x32x32xf32, #tpu.memory_space<vmem>>, %arg6: memref<1x32x32xf32, #tpu.memory_space<vmem>>, %arg7: memref<1x16x16xf32, #tpu.memory_space<vmem>>, %arg8: memref<1x16x16xf32, #tpu.memory_space<vmem>>, %arg9: memref<1x1x1xf32, #tpu.memory_space<vmem>>) attributes {dimension_semantics = [#tpu.dimension_semantics<parallel>], iteration_bounds = array<i64: 6>, scalar_prefetch = 0 : i64, scratch_operands = 0 : i64, tpu.core_type = #tpu.core_type<tc>, window_params = [{pipeline_mode = #tpu.pipeline_mode<synchronous>, transform_indices = @transform_0, window_bounds = array<i64: 16, 32>}, {pipeline_mode = #tpu.pipeline_mode<synchronous>, transform_indices = @transform_1, window_bounds = array<i64: 32, 16>}, {pipeline_mode = #tpu.pipeline_mode<synchronous>, transform_indices = @transform_2, window_bounds = array<i64: 32, 16>}, {pipeline_mode = #tpu.pipeline_mode<synchronous>, transform_indices = @transform_3, window_bounds = array<i64: 16, 32>}, {transform_indices = @transform_4, window_bounds = array<i64: 1, 32, 32>}, {transform_indices = @transform_5, window_bounds = array<i64: 1, 32, 32>}, {transform_indices = @transform_6, window_bounds = array<i64: 1, 16, 16>}, {transform_indices = @transform_7, window_bounds = array<i64: 1, 16, 16>}, {transform_indices = @transform_8, window_bounds = array<i64: 1, 1, 1>}]} {
    %c0 = arith.constant 0 : index
    %c0_0 = arith.constant 0 : index
    %c0_1 = arith.constant 0 : index
    %0 = vector.load %arg5[%c0, %c0_0, %c0_1] : memref<1x32x32xf32, #tpu.memory_space<vmem>>, vector<1x32x32xf32>
    %1 = vector.shape_cast %0 : vector<1x32x32xf32> to vector<32x32xf32>
    %c0_2 = arith.constant 0 : index
    %c0_3 = arith.constant 0 : index
    %c0_4 = arith.constant 0 : index
    %2 = vector.load %arg6[%c0_2, %c0_3, %c0_4] : memref<1x32x32xf32, #tpu.memory_space<vmem>>, vector<1x32x32xf32>
    %3 = vector.shape_cast %2 : vector<1x32x32xf32> to vector<32x32xf32>
    %c0_5 = arith.constant 0 : index
    %c0_6 = arith.constant 0 : index
    %4 = vector.load %arg1[%c0_5, %c0_6] : memref<16x32xf32, #tpu.memory_space<vmem>>, vector<16x32xf32>
    %c0_7 = arith.constant 0 : index
    %c0_8 = arith.constant 0 : index
    %5 = vector.load %arg2[%c0_7, %c0_8] : memref<32x16xf32, #tpu.memory_space<vmem>>, vector<32x16xf32>
    %c0_9 = arith.constant 0 : index
    %c0_10 = arith.constant 0 : index
    %6 = vector.load %arg3[%c0_9, %c0_10] : memref<32x16xf32, #tpu.memory_space<vmem>>, vector<32x16xf32>
    %c0_11 = arith.constant 0 : index
    %c0_12 = arith.constant 0 : index
    %7 = vector.load %arg4[%c0_11, %c0_12] : memref<16x32xf32, #tpu.memory_space<vmem>>, vector<16x32xf32>
    %cst = arith.constant dense<0.000000e+00> : vector<32x16xf32>
    %8 = tpu.matmul %1, %5, %cst {dimension_numbers = #tpu.dot_dimension_numbers<[1], [0], [0], [1], [0, 0, 1, 1], [], []>} : vector<32x32xf32>, vector<32x16xf32>, vector<32x16xf32> -> vector<32x16xf32>
    %cst_13 = arith.constant dense<0.000000e+00> : vector<16x16xf32>
    %9 = tpu.matmul %4, %8, %cst_13 {dimension_numbers = #tpu.dot_dimension_numbers<[1], [0], [0], [1], [0, 0, 1, 1], [], []>} : vector<16x32xf32>, vector<32x16xf32>, vector<16x16xf32> -> vector<16x16xf32>
    %cst_14 = arith.constant dense<0.000000e+00> : vector<32x16xf32>
    %10 = tpu.matmul %3, %5, %cst_14 {dimension_numbers = #tpu.dot_dimension_numbers<[1], [0], [0], [1], [0, 0, 1, 1], [], []>} : vector<32x32xf32>, vector<32x16xf32>, vector<32x16xf32> -> vector<32x16xf32>
    %cst_15 = arith.constant dense<0.000000e+00> : vector<16x16xf32>
    %11 = tpu.matmul %4, %10, %cst_15 {dimension_numbers = #tpu.dot_dimension_numbers<[1], [0], [0], [1], [0, 0, 1, 1], [], []>} : vector<16x32xf32>, vector<32x16xf32>, vector<16x16xf32> -> vector<16x16xf32>
    %cst_16 = arith.constant dense<0.000000e+00> : vector<32x16xf32>
    %12 = tpu.matmul %6, %9, %cst_16 {dimension_numbers = #tpu.dot_dimension_numbers<[1], [0], [0], [1], [0, 0, 1, 1], [], []>} : vector<32x16xf32>, vector<16x16xf32>, vector<32x16xf32> -> vector<32x16xf32>
    %cst_17 = arith.constant dense<0.000000e+00> : vector<32x32xf32>
    %13 = tpu.matmul %12, %7, %cst_17 {dimension_numbers = #tpu.dot_dimension_numbers<[1], [0], [0], [1], [0, 0, 1, 1], [], []>} : vector<32x16xf32>, vector<16x32xf32>, vector<32x32xf32> -> vector<32x32xf32>
    %cst_18 = arith.constant dense<0.000000e+00> : vector<32x16xf32>
    %14 = tpu.matmul %6, %11, %cst_18 {dimension_numbers = #tpu.dot_dimension_numbers<[1], [0], [0], [1], [0, 0, 1, 1], [], []>} : vector<32x16xf32>, vector<16x16xf32>, vector<32x16xf32> -> vector<32x16xf32>
    %cst_19 = arith.constant dense<0.000000e+00> : vector<32x32xf32>
    %15 = tpu.matmul %14, %7, %cst_19 {dimension_numbers = #tpu.dot_dimension_numbers<[1], [0], [0], [1], [0, 0, 1, 1], [], []>} : vector<32x16xf32>, vector<16x32xf32>, vector<32x32xf32> -> vector<32x32xf32>
    %16 = arith.subf %1, %3 : vector<32x32xf32>
    %17 = arith.subf %13, %15 : vector<32x32xf32>
    %18 = arith.subf %16, %17 : vector<32x32xf32>
    %19 = math.absf %18 : vector<32x32xf32>
    %cst_20 = arith.constant dense<0.000000e+00> : vector<32xf32>
    %20 = vector.multi_reduction <add>, %19, %cst_20 [1] : vector<32x32xf32> to vector<32xf32>
    %21 = vector.shape_cast %20 : vector<32xf32> to vector<32x1xf32>
    %cst_21 = arith.constant dense<0.000000e+00> : vector<1xf32>
    %22 = vector.multi_reduction <add>, %21, %cst_21 [0] : vector<32x1xf32> to vector<1xf32>
    %23 = vector.shape_cast %22 : vector<1xf32> to vector<1x1xf32>
    %c0_22 = arith.constant 0 : index
    %c0_23 = arith.constant 0 : index
    %c0_24 = arith.constant 0 : index
    %24 = vector.load %arg7[%c0_22, %c0_23, %c0_24] : memref<1x16x16xf32, #tpu.memory_space<vmem>>, vector<1x16x16xf32>
    %25 = vector.shape_cast %24 : vector<1x16x16xf32> to vector<16x16xf32>
    %26 = vector.shape_cast %9 : vector<16x16xf32> to vector<1x16x16xf32>
    tpu.vector_store %arg7[%c0_22, %c0_23, %c0_24], %26 {strides = array<i32>} : memref<1x16x16xf32, #tpu.memory_space<vmem>>, vector<1x16x16xf32>,
    %c0_25 = arith.constant 0 : index
    %c0_26 = arith.constant 0 : index
    %c0_27 = arith.constant 0 : index
    %27 = vector.load %arg8[%c0_25, %c0_26, %c0_27] : memref<1x16x16xf32, #tpu.memory_space<vmem>>, vector<1x16x16xf32>
    %28 = vector.shape_cast %27 : vector<1x16x16xf32> to vector<16x16xf32>
    %29 = vector.shape_cast %11 : vector<16x16xf32> to vector<1x16x16xf32>
    tpu.vector_store %arg8[%c0_25, %c0_26, %c0_27], %29 {strides = array<i32>} : memref<1x16x16xf32, #tpu.memory_space<vmem>>, vector<1x16x16xf32>,
    %c0_28 = arith.constant 0 : index
    %c0_29 = arith.constant 0 : index
    %c0_30 = arith.constant 0 : index
    %30 = vector.load %arg9[%c0_28, %c0_29, %c0_30] : memref<1x1x1xf32, #tpu.memory_space<vmem>>, vector<1x1x1xf32>
    %31 = vector.shape_cast %30 : vector<1x1x1xf32> to vector<1x1xf32>
    %32 = vector.shape_cast %23 : vector<1x1xf32> to vector<1x1x1xf32>
    tpu.vector_store %arg9[%c0_28, %c0_29, %c0_30], %32 {strides = array<i32>} : memref<1x1x1xf32, #tpu.memory_space<vmem>>, vector<1x1x1xf32>,
    return
  }
  func.func @transform_0(%arg0: i32) -> (i32, i32) {
    %c0_i32 = arith.constant 0 : i32
    %c0_i32_0 = arith.constant 0 : i32
    %c0_i32_1 = arith.constant 0 : i32
    return %c0_i32, %c0_i32_0 : i32, i32
  }
  func.func @transform_1(%arg0: i32) -> (i32, i32) {
    %c0_i32 = arith.constant 0 : i32
    %c0_i32_0 = arith.constant 0 : i32
    %c0_i32_1 = arith.constant 0 : i32
    return %c0_i32, %c0_i32_0 : i32, i32
  }
  func.func @transform_2(%arg0: i32) -> (i32, i32) {
    %c0_i32 = arith.constant 0 : i32
    %c0_i32_0 = arith.constant 0 : i32
    %c0_i32_1 = arith.constant 0 : i32
    return %c0_i32, %c0_i32_0 : i32, i32
  }
  func.func @transform_3(%arg0: i32) -> (i32, i32) {
    %c0_i32 = arith.constant 0 : i32
    %c0_i32_0 = arith.constant 0 : i32
    %c0_i32_1 = arith.constant 0 : i32
    return %c0_i32, %c0_i32_0 : i32, i32
  }
  func.func @transform_4(%arg0: i32) -> (i32, i32, i32) {
    %c0_i32 = arith.constant 0 : i32
    %c0_i32_0 = arith.constant 0 : i32
    %c0_i32_1 = arith.constant 0 : i32
    return %arg0, %c0_i32, %c0_i32_0 : i32, i32, i32
  }
  func.func @transform_5(%arg0: i32) -> (i32, i32, i32) {
    %c0_i32 = arith.constant 0 : i32
    %c0_i32_0 = arith.constant 0 : i32
    %c0_i32_1 = arith.constant 0 : i32
    return %arg0, %c0_i32, %c0_i32_0 : i32, i32, i32
  }
  func.func @transform_6(%arg0: i32) -> (i32, i32, i32) {
    %c0_i32 = arith.constant 0 : i32
    %c0_i32_0 = arith.constant 0 : i32
    %c0_i32_1 = arith.constant 0 : i32
    return %arg0, %c0_i32, %c0_i32_0 : i32, i32, i32
  }
  func.func @transform_7(%arg0: i32) -> (i32, i32, i32) {
    %c0_i32 = arith.constant 0 : i32
    %c0_i32_0 = arith.constant 0 : i32
    %c0_i32_1 = arith.constant 0 : i32
    return %arg0, %c0_i32, %c0_i32_0 : i32, i32, i32
  }
  func.func @transform_8(%arg0: i32) -> (i32, i32, i32) {
    %c0_i32 = arith.constant 0 : i32
    %c0_i32_0 = arith.constant 0 : i32
    %c0_i32_1 = arith.constant 0 : i32
    return %arg0, %c0_i32, %c0_i32_0 : i32, i32, i32
  }
}

module attributes {stable_mosaic.version = 11 : i64} {
  func.func @_lap_level_kernel(%arg0: i32, %arg1: memref<32x64xf32, #tpu.memory_space<vmem>>, %arg2: memref<64x32xf32, #tpu.memory_space<vmem>>, %arg3: memref<64x32xf32, #tpu.memory_space<vmem>>, %arg4: memref<32x64xf32, #tpu.memory_space<vmem>>, %arg5: memref<1x64x64xf32, #tpu.memory_space<vmem>>, %arg6: memref<1x64x64xf32, #tpu.memory_space<vmem>>, %arg7: memref<1x32x32xf32, #tpu.memory_space<vmem>>, %arg8: memref<1x32x32xf32, #tpu.memory_space<vmem>>, %arg9: memref<1x1x1xf32, #tpu.memory_space<vmem>>) attributes {dimension_semantics = [#tpu.dimension_semantics<parallel>], iteration_bounds = array<i64: 6>, scalar_prefetch = 0 : i64, scratch_operands = 0 : i64, tpu.core_type = #tpu.core_type<tc>, window_params = [{pipeline_mode = #tpu.pipeline_mode<synchronous>, transform_indices = @transform_0, window_bounds = array<i64: 32, 64>}, {pipeline_mode = #tpu.pipeline_mode<synchronous>, transform_indices = @transform_1, window_bounds = array<i64: 64, 32>}, {pipeline_mode = #tpu.pipeline_mode<synchronous>, transform_indices = @transform_2, window_bounds = array<i64: 64, 32>}, {pipeline_mode = #tpu.pipeline_mode<synchronous>, transform_indices = @transform_3, window_bounds = array<i64: 32, 64>}, {transform_indices = @transform_4, window_bounds = array<i64: 1, 64, 64>}, {transform_indices = @transform_5, window_bounds = array<i64: 1, 64, 64>}, {transform_indices = @transform_6, window_bounds = array<i64: 1, 32, 32>}, {transform_indices = @transform_7, window_bounds = array<i64: 1, 32, 32>}, {transform_indices = @transform_8, window_bounds = array<i64: 1, 1, 1>}]} {
    %c0 = arith.constant 0 : index
    %c0_0 = arith.constant 0 : index
    %c0_1 = arith.constant 0 : index
    %0 = vector.load %arg5[%c0, %c0_0, %c0_1] : memref<1x64x64xf32, #tpu.memory_space<vmem>>, vector<1x64x64xf32>
    %1 = vector.shape_cast %0 : vector<1x64x64xf32> to vector<64x64xf32>
    %c0_2 = arith.constant 0 : index
    %c0_3 = arith.constant 0 : index
    %c0_4 = arith.constant 0 : index
    %2 = vector.load %arg6[%c0_2, %c0_3, %c0_4] : memref<1x64x64xf32, #tpu.memory_space<vmem>>, vector<1x64x64xf32>
    %3 = vector.shape_cast %2 : vector<1x64x64xf32> to vector<64x64xf32>
    %c0_5 = arith.constant 0 : index
    %c0_6 = arith.constant 0 : index
    %4 = vector.load %arg1[%c0_5, %c0_6] : memref<32x64xf32, #tpu.memory_space<vmem>>, vector<32x64xf32>
    %c0_7 = arith.constant 0 : index
    %c0_8 = arith.constant 0 : index
    %5 = vector.load %arg2[%c0_7, %c0_8] : memref<64x32xf32, #tpu.memory_space<vmem>>, vector<64x32xf32>
    %c0_9 = arith.constant 0 : index
    %c0_10 = arith.constant 0 : index
    %6 = vector.load %arg3[%c0_9, %c0_10] : memref<64x32xf32, #tpu.memory_space<vmem>>, vector<64x32xf32>
    %c0_11 = arith.constant 0 : index
    %c0_12 = arith.constant 0 : index
    %7 = vector.load %arg4[%c0_11, %c0_12] : memref<32x64xf32, #tpu.memory_space<vmem>>, vector<32x64xf32>
    %cst = arith.constant dense<0.000000e+00> : vector<64x32xf32>
    %8 = tpu.matmul %1, %5, %cst {dimension_numbers = #tpu.dot_dimension_numbers<[1], [0], [0], [1], [0, 0, 1, 1], [], []>} : vector<64x64xf32>, vector<64x32xf32>, vector<64x32xf32> -> vector<64x32xf32>
    %cst_13 = arith.constant dense<0.000000e+00> : vector<32x32xf32>
    %9 = tpu.matmul %4, %8, %cst_13 {dimension_numbers = #tpu.dot_dimension_numbers<[1], [0], [0], [1], [0, 0, 1, 1], [], []>} : vector<32x64xf32>, vector<64x32xf32>, vector<32x32xf32> -> vector<32x32xf32>
    %cst_14 = arith.constant dense<0.000000e+00> : vector<64x32xf32>
    %10 = tpu.matmul %3, %5, %cst_14 {dimension_numbers = #tpu.dot_dimension_numbers<[1], [0], [0], [1], [0, 0, 1, 1], [], []>} : vector<64x64xf32>, vector<64x32xf32>, vector<64x32xf32> -> vector<64x32xf32>
    %cst_15 = arith.constant dense<0.000000e+00> : vector<32x32xf32>
    %11 = tpu.matmul %4, %10, %cst_15 {dimension_numbers = #tpu.dot_dimension_numbers<[1], [0], [0], [1], [0, 0, 1, 1], [], []>} : vector<32x64xf32>, vector<64x32xf32>, vector<32x32xf32> -> vector<32x32xf32>
    %cst_16 = arith.constant dense<0.000000e+00> : vector<64x32xf32>
    %12 = tpu.matmul %6, %9, %cst_16 {dimension_numbers = #tpu.dot_dimension_numbers<[1], [0], [0], [1], [0, 0, 1, 1], [], []>} : vector<64x32xf32>, vector<32x32xf32>, vector<64x32xf32> -> vector<64x32xf32>
    %cst_17 = arith.constant dense<0.000000e+00> : vector<64x64xf32>
    %13 = tpu.matmul %12, %7, %cst_17 {dimension_numbers = #tpu.dot_dimension_numbers<[1], [0], [0], [1], [0, 0, 1, 1], [], []>} : vector<64x32xf32>, vector<32x64xf32>, vector<64x64xf32> -> vector<64x64xf32>
    %cst_18 = arith.constant dense<0.000000e+00> : vector<64x32xf32>
    %14 = tpu.matmul %6, %11, %cst_18 {dimension_numbers = #tpu.dot_dimension_numbers<[1], [0], [0], [1], [0, 0, 1, 1], [], []>} : vector<64x32xf32>, vector<32x32xf32>, vector<64x32xf32> -> vector<64x32xf32>
    %cst_19 = arith.constant dense<0.000000e+00> : vector<64x64xf32>
    %15 = tpu.matmul %14, %7, %cst_19 {dimension_numbers = #tpu.dot_dimension_numbers<[1], [0], [0], [1], [0, 0, 1, 1], [], []>} : vector<64x32xf32>, vector<32x64xf32>, vector<64x64xf32> -> vector<64x64xf32>
    %16 = arith.subf %1, %3 : vector<64x64xf32>
    %17 = arith.subf %13, %15 : vector<64x64xf32>
    %18 = arith.subf %16, %17 : vector<64x64xf32>
    %19 = math.absf %18 : vector<64x64xf32>
    %cst_20 = arith.constant dense<0.000000e+00> : vector<64xf32>
    %20 = vector.multi_reduction <add>, %19, %cst_20 [1] : vector<64x64xf32> to vector<64xf32>
    %21 = vector.shape_cast %20 : vector<64xf32> to vector<64x1xf32>
    %cst_21 = arith.constant dense<0.000000e+00> : vector<1xf32>
    %22 = vector.multi_reduction <add>, %21, %cst_21 [0] : vector<64x1xf32> to vector<1xf32>
    %23 = vector.shape_cast %22 : vector<1xf32> to vector<1x1xf32>
    %c0_22 = arith.constant 0 : index
    %c0_23 = arith.constant 0 : index
    %c0_24 = arith.constant 0 : index
    %24 = vector.load %arg7[%c0_22, %c0_23, %c0_24] : memref<1x32x32xf32, #tpu.memory_space<vmem>>, vector<1x32x32xf32>
    %25 = vector.shape_cast %24 : vector<1x32x32xf32> to vector<32x32xf32>
    %26 = vector.shape_cast %9 : vector<32x32xf32> to vector<1x32x32xf32>
    tpu.vector_store %arg7[%c0_22, %c0_23, %c0_24], %26 {strides = array<i32>} : memref<1x32x32xf32, #tpu.memory_space<vmem>>, vector<1x32x32xf32>,
    %c0_25 = arith.constant 0 : index
    %c0_26 = arith.constant 0 : index
    %c0_27 = arith.constant 0 : index
    %27 = vector.load %arg8[%c0_25, %c0_26, %c0_27] : memref<1x32x32xf32, #tpu.memory_space<vmem>>, vector<1x32x32xf32>
    %28 = vector.shape_cast %27 : vector<1x32x32xf32> to vector<32x32xf32>
    %29 = vector.shape_cast %11 : vector<32x32xf32> to vector<1x32x32xf32>
    tpu.vector_store %arg8[%c0_25, %c0_26, %c0_27], %29 {strides = array<i32>} : memref<1x32x32xf32, #tpu.memory_space<vmem>>, vector<1x32x32xf32>,
    %c0_28 = arith.constant 0 : index
    %c0_29 = arith.constant 0 : index
    %c0_30 = arith.constant 0 : index
    %30 = vector.load %arg9[%c0_28, %c0_29, %c0_30] : memref<1x1x1xf32, #tpu.memory_space<vmem>>, vector<1x1x1xf32>
    %31 = vector.shape_cast %30 : vector<1x1x1xf32> to vector<1x1xf32>
    %32 = vector.shape_cast %23 : vector<1x1xf32> to vector<1x1x1xf32>
    tpu.vector_store %arg9[%c0_28, %c0_29, %c0_30], %32 {strides = array<i32>} : memref<1x1x1xf32, #tpu.memory_space<vmem>>, vector<1x1x1xf32>,
    return
  }
  func.func @transform_0(%arg0: i32) -> (i32, i32) {
    %c0_i32 = arith.constant 0 : i32
    %c0_i32_0 = arith.constant 0 : i32
    %c0_i32_1 = arith.constant 0 : i32
    return %c0_i32, %c0_i32_0 : i32, i32
  }
  func.func @transform_1(%arg0: i32) -> (i32, i32) {
    %c0_i32 = arith.constant 0 : i32
    %c0_i32_0 = arith.constant 0 : i32
    %c0_i32_1 = arith.constant 0 : i32
    return %c0_i32, %c0_i32_0 : i32, i32
  }
  func.func @transform_2(%arg0: i32) -> (i32, i32) {
    %c0_i32 = arith.constant 0 : i32
    %c0_i32_0 = arith.constant 0 : i32
    %c0_i32_1 = arith.constant 0 : i32
    return %c0_i32, %c0_i32_0 : i32, i32
  }
  func.func @transform_3(%arg0: i32) -> (i32, i32) {
    %c0_i32 = arith.constant 0 : i32
    %c0_i32_0 = arith.constant 0 : i32
    %c0_i32_1 = arith.constant 0 : i32
    return %c0_i32, %c0_i32_0 : i32, i32
  }
  func.func @transform_4(%arg0: i32) -> (i32, i32, i32) {
    %c0_i32 = arith.constant 0 : i32
    %c0_i32_0 = arith.constant 0 : i32
    %c0_i32_1 = arith.constant 0 : i32
    return %arg0, %c0_i32, %c0_i32_0 : i32, i32, i32
  }
  func.func @transform_5(%arg0: i32) -> (i32, i32, i32) {
    %c0_i32 = arith.constant 0 : i32
    %c0_i32_0 = arith.constant 0 : i32
    %c0_i32_1 = arith.constant 0 : i32
    return %arg0, %c0_i32, %c0_i32_0 : i32, i32, i32
  }
  func.func @transform_6(%arg0: i32) -> (i32, i32, i32) {
    %c0_i32 = arith.constant 0 : i32
    %c0_i32_0 = arith.constant 0 : i32
    %c0_i32_1 = arith.constant 0 : i32
    return %arg0, %c0_i32, %c0_i32_0 : i32, i32, i32
  }
  func.func @transform_7(%arg0: i32) -> (i32, i32, i32) {
    %c0_i32 = arith.constant 0 : i32
    %c0_i32_0 = arith.constant 0 : i32
    %c0_i32_1 = arith.constant 0 : i32
    return %arg0, %c0_i32, %c0_i32_0 : i32, i32, i32
  }
  func.func @transform_8(%arg0: i32) -> (i32, i32, i32) {
    %c0_i32 = arith.constant 0 : i32
    %c0_i32_0 = arith.constant 0 : i32
    %c0_i32_1 = arith.constant 0 : i32
    return %arg0, %c0_i32, %c0_i32_0 : i32, i32, i32
  }
}

module attributes {stable_mosaic.version = 11 : i64} {
  func.func @_lap_level_kernel(%arg0: i32, %arg1: memref<4x8xf32, #tpu.memory_space<vmem>>, %arg2: memref<8x4xf32, #tpu.memory_space<vmem>>, %arg3: memref<8x4xf32, #tpu.memory_space<vmem>>, %arg4: memref<4x8xf32, #tpu.memory_space<vmem>>, %arg5: memref<1x8x8xf32, #tpu.memory_space<vmem>>, %arg6: memref<1x8x8xf32, #tpu.memory_space<vmem>>, %arg7: memref<1x4x4xf32, #tpu.memory_space<vmem>>, %arg8: memref<1x4x4xf32, #tpu.memory_space<vmem>>, %arg9: memref<1x1x1xf32, #tpu.memory_space<vmem>>) attributes {dimension_semantics = [#tpu.dimension_semantics<parallel>], iteration_bounds = array<i64: 6>, scalar_prefetch = 0 : i64, scratch_operands = 0 : i64, tpu.core_type = #tpu.core_type<tc>, window_params = [{pipeline_mode = #tpu.pipeline_mode<synchronous>, transform_indices = @transform_0, window_bounds = array<i64: 4, 8>}, {pipeline_mode = #tpu.pipeline_mode<synchronous>, transform_indices = @transform_1, window_bounds = array<i64: 8, 4>}, {pipeline_mode = #tpu.pipeline_mode<synchronous>, transform_indices = @transform_2, window_bounds = array<i64: 8, 4>}, {pipeline_mode = #tpu.pipeline_mode<synchronous>, transform_indices = @transform_3, window_bounds = array<i64: 4, 8>}, {transform_indices = @transform_4, window_bounds = array<i64: 1, 8, 8>}, {transform_indices = @transform_5, window_bounds = array<i64: 1, 8, 8>}, {transform_indices = @transform_6, window_bounds = array<i64: 1, 4, 4>}, {transform_indices = @transform_7, window_bounds = array<i64: 1, 4, 4>}, {transform_indices = @transform_8, window_bounds = array<i64: 1, 1, 1>}]} {
    %c0 = arith.constant 0 : index
    %c0_0 = arith.constant 0 : index
    %c0_1 = arith.constant 0 : index
    %0 = vector.load %arg5[%c0, %c0_0, %c0_1] : memref<1x8x8xf32, #tpu.memory_space<vmem>>, vector<1x8x8xf32>
    %1 = vector.shape_cast %0 : vector<1x8x8xf32> to vector<8x8xf32>
    %c0_2 = arith.constant 0 : index
    %c0_3 = arith.constant 0 : index
    %c0_4 = arith.constant 0 : index
    %2 = vector.load %arg6[%c0_2, %c0_3, %c0_4] : memref<1x8x8xf32, #tpu.memory_space<vmem>>, vector<1x8x8xf32>
    %3 = vector.shape_cast %2 : vector<1x8x8xf32> to vector<8x8xf32>
    %c0_5 = arith.constant 0 : index
    %c0_6 = arith.constant 0 : index
    %4 = vector.load %arg1[%c0_5, %c0_6] : memref<4x8xf32, #tpu.memory_space<vmem>>, vector<4x8xf32>
    %c0_7 = arith.constant 0 : index
    %c0_8 = arith.constant 0 : index
    %5 = vector.load %arg2[%c0_7, %c0_8] : memref<8x4xf32, #tpu.memory_space<vmem>>, vector<8x4xf32>
    %c0_9 = arith.constant 0 : index
    %c0_10 = arith.constant 0 : index
    %6 = vector.load %arg3[%c0_9, %c0_10] : memref<8x4xf32, #tpu.memory_space<vmem>>, vector<8x4xf32>
    %c0_11 = arith.constant 0 : index
    %c0_12 = arith.constant 0 : index
    %7 = vector.load %arg4[%c0_11, %c0_12] : memref<4x8xf32, #tpu.memory_space<vmem>>, vector<4x8xf32>
    %cst = arith.constant dense<0.000000e+00> : vector<8x4xf32>
    %8 = tpu.matmul %1, %5, %cst {dimension_numbers = #tpu.dot_dimension_numbers<[1], [0], [0], [1], [0, 0, 1, 1], [], []>} : vector<8x8xf32>, vector<8x4xf32>, vector<8x4xf32> -> vector<8x4xf32>
    %cst_13 = arith.constant dense<0.000000e+00> : vector<4x4xf32>
    %9 = tpu.matmul %4, %8, %cst_13 {dimension_numbers = #tpu.dot_dimension_numbers<[1], [0], [0], [1], [0, 0, 1, 1], [], []>} : vector<4x8xf32>, vector<8x4xf32>, vector<4x4xf32> -> vector<4x4xf32>
    %cst_14 = arith.constant dense<0.000000e+00> : vector<8x4xf32>
    %10 = tpu.matmul %3, %5, %cst_14 {dimension_numbers = #tpu.dot_dimension_numbers<[1], [0], [0], [1], [0, 0, 1, 1], [], []>} : vector<8x8xf32>, vector<8x4xf32>, vector<8x4xf32> -> vector<8x4xf32>
    %cst_15 = arith.constant dense<0.000000e+00> : vector<4x4xf32>
    %11 = tpu.matmul %4, %10, %cst_15 {dimension_numbers = #tpu.dot_dimension_numbers<[1], [0], [0], [1], [0, 0, 1, 1], [], []>} : vector<4x8xf32>, vector<8x4xf32>, vector<4x4xf32> -> vector<4x4xf32>
    %cst_16 = arith.constant dense<0.000000e+00> : vector<8x4xf32>
    %12 = tpu.matmul %6, %9, %cst_16 {dimension_numbers = #tpu.dot_dimension_numbers<[1], [0], [0], [1], [0, 0, 1, 1], [], []>} : vector<8x4xf32>, vector<4x4xf32>, vector<8x4xf32> -> vector<8x4xf32>
    %cst_17 = arith.constant dense<0.000000e+00> : vector<8x8xf32>
    %13 = tpu.matmul %12, %7, %cst_17 {dimension_numbers = #tpu.dot_dimension_numbers<[1], [0], [0], [1], [0, 0, 1, 1], [], []>} : vector<8x4xf32>, vector<4x8xf32>, vector<8x8xf32> -> vector<8x8xf32>
    %cst_18 = arith.constant dense<0.000000e+00> : vector<8x4xf32>
    %14 = tpu.matmul %6, %11, %cst_18 {dimension_numbers = #tpu.dot_dimension_numbers<[1], [0], [0], [1], [0, 0, 1, 1], [], []>} : vector<8x4xf32>, vector<4x4xf32>, vector<8x4xf32> -> vector<8x4xf32>
    %cst_19 = arith.constant dense<0.000000e+00> : vector<8x8xf32>
    %15 = tpu.matmul %14, %7, %cst_19 {dimension_numbers = #tpu.dot_dimension_numbers<[1], [0], [0], [1], [0, 0, 1, 1], [], []>} : vector<8x4xf32>, vector<4x8xf32>, vector<8x8xf32> -> vector<8x8xf32>
    %16 = arith.subf %1, %3 : vector<8x8xf32>
    %17 = arith.subf %13, %15 : vector<8x8xf32>
    %18 = arith.subf %16, %17 : vector<8x8xf32>
    %19 = math.absf %18 : vector<8x8xf32>
    %cst_20 = arith.constant dense<0.000000e+00> : vector<8xf32>
    %20 = vector.multi_reduction <add>, %19, %cst_20 [1] : vector<8x8xf32> to vector<8xf32>
    %21 = vector.shape_cast %20 : vector<8xf32> to vector<8x1xf32>
    %cst_21 = arith.constant dense<0.000000e+00> : vector<1xf32>
    %22 = vector.multi_reduction <add>, %21, %cst_21 [0] : vector<8x1xf32> to vector<1xf32>
    %23 = vector.shape_cast %22 : vector<1xf32> to vector<1x1xf32>
    %c0_22 = arith.constant 0 : index
    %c0_23 = arith.constant 0 : index
    %c0_24 = arith.constant 0 : index
    %24 = vector.load %arg7[%c0_22, %c0_23, %c0_24] : memref<1x4x4xf32, #tpu.memory_space<vmem>>, vector<1x4x4xf32>
    %25 = vector.shape_cast %24 : vector<1x4x4xf32> to vector<4x4xf32>
    %26 = vector.shape_cast %9 : vector<4x4xf32> to vector<1x4x4xf32>
    tpu.vector_store %arg7[%c0_22, %c0_23, %c0_24], %26 {strides = array<i32>} : memref<1x4x4xf32, #tpu.memory_space<vmem>>, vector<1x4x4xf32>,
    %c0_25 = arith.constant 0 : index
    %c0_26 = arith.constant 0 : index
    %c0_27 = arith.constant 0 : index
    %27 = vector.load %arg8[%c0_25, %c0_26, %c0_27] : memref<1x4x4xf32, #tpu.memory_space<vmem>>, vector<1x4x4xf32>
    %28 = vector.shape_cast %27 : vector<1x4x4xf32> to vector<4x4xf32>
    %29 = vector.shape_cast %11 : vector<4x4xf32> to vector<1x4x4xf32>
    tpu.vector_store %arg8[%c0_25, %c0_26, %c0_27], %29 {strides = array<i32>} : memref<1x4x4xf32, #tpu.memory_space<vmem>>, vector<1x4x4xf32>,
    %c0_28 = arith.constant 0 : index
    %c0_29 = arith.constant 0 : index
    %c0_30 = arith.constant 0 : index
    %30 = vector.load %arg9[%c0_28, %c0_29, %c0_30] : memref<1x1x1xf32, #tpu.memory_space<vmem>>, vector<1x1x1xf32>
    %31 = vector.shape_cast %30 : vector<1x1x1xf32> to vector<1x1xf32>
    %32 = vector.shape_cast %23 : vector<1x1xf32> to vector<1x1x1xf32>
    tpu.vector_store %arg9[%c0_28, %c0_29, %c0_30], %32 {strides = array<i32>} : memref<1x1x1xf32, #tpu.memory_space<vmem>>, vector<1x1x1xf32>,
    return
  }
  func.func @transform_0(%arg0: i32) -> (i32, i32) {
    %c0_i32 = arith.constant 0 : i32
    %c0_i32_0 = arith.constant 0 : i32
    %c0_i32_1 = arith.constant 0 : i32
    return %c0_i32, %c0_i32_0 : i32, i32
  }
  func.func @transform_1(%arg0: i32) -> (i32, i32) {
    %c0_i32 = arith.constant 0 : i32
    %c0_i32_0 = arith.constant 0 : i32
    %c0_i32_1 = arith.constant 0 : i32
    return %c0_i32, %c0_i32_0 : i32, i32
  }
  func.func @transform_2(%arg0: i32) -> (i32, i32) {
    %c0_i32 = arith.constant 0 : i32
    %c0_i32_0 = arith.constant 0 : i32
    %c0_i32_1 = arith.constant 0 : i32
    return %c0_i32, %c0_i32_0 : i32, i32
  }
  func.func @transform_3(%arg0: i32) -> (i32, i32) {
    %c0_i32 = arith.constant 0 : i32
    %c0_i32_0 = arith.constant 0 : i32
    %c0_i32_1 = arith.constant 0 : i32
    return %c0_i32, %c0_i32_0 : i32, i32
  }
  func.func @transform_4(%arg0: i32) -> (i32, i32, i32) {
    %c0_i32 = arith.constant 0 : i32
    %c0_i32_0 = arith.constant 0 : i32
    %c0_i32_1 = arith.constant 0 : i32
    return %arg0, %c0_i32, %c0_i32_0 : i32, i32, i32
  }
  func.func @transform_5(%arg0: i32) -> (i32, i32, i32) {
    %c0_i32 = arith.constant 0 : i32
    %c0_i32_0 = arith.constant 0 : i32
    %c0_i32_1 = arith.constant 0 : i32
    return %arg0, %c0_i32, %c0_i32_0 : i32, i32, i32
  }
  func.func @transform_6(%arg0: i32) -> (i32, i32, i32) {
    %c0_i32 = arith.constant 0 : i32
    %c0_i32_0 = arith.constant 0 : i32
    %c0_i32_1 = arith.constant 0 : i32
    return %arg0, %c0_i32, %c0_i32_0 : i32, i32, i32
  }
  func.func @transform_7(%arg0: i32) -> (i32, i32, i32) {
    %c0_i32 = arith.constant 0 : i32
    %c0_i32_0 = arith.constant 0 : i32
    %c0_i32_1 = arith.constant 0 : i32
    return %arg0, %c0_i32, %c0_i32_0 : i32, i32, i32
  }
  func.func @transform_8(%arg0: i32) -> (i32, i32, i32) {
    %c0_i32 = arith.constant 0 : i32
    %c0_i32_0 = arith.constant 0 : i32
    %c0_i32_1 = arith.constant 0 : i32
    return %arg0, %c0_i32, %c0_i32_0 : i32, i32, i32
  }
}

module attributes {stable_mosaic.version = 11 : i64} {
  func.func @_lap_level_kernel(%arg0: i32, %arg1: memref<2x4xf32, #tpu.memory_space<vmem>>, %arg2: memref<4x2xf32, #tpu.memory_space<vmem>>, %arg3: memref<4x2xf32, #tpu.memory_space<vmem>>, %arg4: memref<2x4xf32, #tpu.memory_space<vmem>>, %arg5: memref<1x4x4xf32, #tpu.memory_space<vmem>>, %arg6: memref<1x4x4xf32, #tpu.memory_space<vmem>>, %arg7: memref<1x2x2xf32, #tpu.memory_space<vmem>>, %arg8: memref<1x2x2xf32, #tpu.memory_space<vmem>>, %arg9: memref<1x1x1xf32, #tpu.memory_space<vmem>>) attributes {dimension_semantics = [#tpu.dimension_semantics<parallel>], iteration_bounds = array<i64: 6>, scalar_prefetch = 0 : i64, scratch_operands = 0 : i64, tpu.core_type = #tpu.core_type<tc>, window_params = [{pipeline_mode = #tpu.pipeline_mode<synchronous>, transform_indices = @transform_0, window_bounds = array<i64: 2, 4>}, {pipeline_mode = #tpu.pipeline_mode<synchronous>, transform_indices = @transform_1, window_bounds = array<i64: 4, 2>}, {pipeline_mode = #tpu.pipeline_mode<synchronous>, transform_indices = @transform_2, window_bounds = array<i64: 4, 2>}, {pipeline_mode = #tpu.pipeline_mode<synchronous>, transform_indices = @transform_3, window_bounds = array<i64: 2, 4>}, {transform_indices = @transform_4, window_bounds = array<i64: 1, 4, 4>}, {transform_indices = @transform_5, window_bounds = array<i64: 1, 4, 4>}, {transform_indices = @transform_6, window_bounds = array<i64: 1, 2, 2>}, {transform_indices = @transform_7, window_bounds = array<i64: 1, 2, 2>}, {transform_indices = @transform_8, window_bounds = array<i64: 1, 1, 1>}]} {
    %c0 = arith.constant 0 : index
    %c0_0 = arith.constant 0 : index
    %c0_1 = arith.constant 0 : index
    %0 = vector.load %arg5[%c0, %c0_0, %c0_1] : memref<1x4x4xf32, #tpu.memory_space<vmem>>, vector<1x4x4xf32>
    %1 = vector.shape_cast %0 : vector<1x4x4xf32> to vector<4x4xf32>
    %c0_2 = arith.constant 0 : index
    %c0_3 = arith.constant 0 : index
    %c0_4 = arith.constant 0 : index
    %2 = vector.load %arg6[%c0_2, %c0_3, %c0_4] : memref<1x4x4xf32, #tpu.memory_space<vmem>>, vector<1x4x4xf32>
    %3 = vector.shape_cast %2 : vector<1x4x4xf32> to vector<4x4xf32>
    %c0_5 = arith.constant 0 : index
    %c0_6 = arith.constant 0 : index
    %4 = vector.load %arg1[%c0_5, %c0_6] : memref<2x4xf32, #tpu.memory_space<vmem>>, vector<2x4xf32>
    %c0_7 = arith.constant 0 : index
    %c0_8 = arith.constant 0 : index
    %5 = vector.load %arg2[%c0_7, %c0_8] : memref<4x2xf32, #tpu.memory_space<vmem>>, vector<4x2xf32>
    %c0_9 = arith.constant 0 : index
    %c0_10 = arith.constant 0 : index
    %6 = vector.load %arg3[%c0_9, %c0_10] : memref<4x2xf32, #tpu.memory_space<vmem>>, vector<4x2xf32>
    %c0_11 = arith.constant 0 : index
    %c0_12 = arith.constant 0 : index
    %7 = vector.load %arg4[%c0_11, %c0_12] : memref<2x4xf32, #tpu.memory_space<vmem>>, vector<2x4xf32>
    %cst = arith.constant dense<0.000000e+00> : vector<4x2xf32>
    %8 = tpu.matmul %1, %5, %cst {dimension_numbers = #tpu.dot_dimension_numbers<[1], [0], [0], [1], [0, 0, 1, 1], [], []>} : vector<4x4xf32>, vector<4x2xf32>, vector<4x2xf32> -> vector<4x2xf32>
    %cst_13 = arith.constant dense<0.000000e+00> : vector<2x2xf32>
    %9 = tpu.matmul %4, %8, %cst_13 {dimension_numbers = #tpu.dot_dimension_numbers<[1], [0], [0], [1], [0, 0, 1, 1], [], []>} : vector<2x4xf32>, vector<4x2xf32>, vector<2x2xf32> -> vector<2x2xf32>
    %cst_14 = arith.constant dense<0.000000e+00> : vector<4x2xf32>
    %10 = tpu.matmul %3, %5, %cst_14 {dimension_numbers = #tpu.dot_dimension_numbers<[1], [0], [0], [1], [0, 0, 1, 1], [], []>} : vector<4x4xf32>, vector<4x2xf32>, vector<4x2xf32> -> vector<4x2xf32>
    %cst_15 = arith.constant dense<0.000000e+00> : vector<2x2xf32>
    %11 = tpu.matmul %4, %10, %cst_15 {dimension_numbers = #tpu.dot_dimension_numbers<[1], [0], [0], [1], [0, 0, 1, 1], [], []>} : vector<2x4xf32>, vector<4x2xf32>, vector<2x2xf32> -> vector<2x2xf32>
    %cst_16 = arith.constant dense<0.000000e+00> : vector<4x2xf32>
    %12 = tpu.matmul %6, %9, %cst_16 {dimension_numbers = #tpu.dot_dimension_numbers<[1], [0], [0], [1], [0, 0, 1, 1], [], []>} : vector<4x2xf32>, vector<2x2xf32>, vector<4x2xf32> -> vector<4x2xf32>
    %cst_17 = arith.constant dense<0.000000e+00> : vector<4x4xf32>
    %13 = tpu.matmul %12, %7, %cst_17 {dimension_numbers = #tpu.dot_dimension_numbers<[1], [0], [0], [1], [0, 0, 1, 1], [], []>} : vector<4x2xf32>, vector<2x4xf32>, vector<4x4xf32> -> vector<4x4xf32>
    %cst_18 = arith.constant dense<0.000000e+00> : vector<4x2xf32>
    %14 = tpu.matmul %6, %11, %cst_18 {dimension_numbers = #tpu.dot_dimension_numbers<[1], [0], [0], [1], [0, 0, 1, 1], [], []>} : vector<4x2xf32>, vector<2x2xf32>, vector<4x2xf32> -> vector<4x2xf32>
    %cst_19 = arith.constant dense<0.000000e+00> : vector<4x4xf32>
    %15 = tpu.matmul %14, %7, %cst_19 {dimension_numbers = #tpu.dot_dimension_numbers<[1], [0], [0], [1], [0, 0, 1, 1], [], []>} : vector<4x2xf32>, vector<2x4xf32>, vector<4x4xf32> -> vector<4x4xf32>
    %16 = arith.subf %1, %3 : vector<4x4xf32>
    %17 = arith.subf %13, %15 : vector<4x4xf32>
    %18 = arith.subf %16, %17 : vector<4x4xf32>
    %19 = math.absf %18 : vector<4x4xf32>
    %cst_20 = arith.constant dense<0.000000e+00> : vector<4xf32>
    %20 = vector.multi_reduction <add>, %19, %cst_20 [1] : vector<4x4xf32> to vector<4xf32>
    %21 = vector.shape_cast %20 : vector<4xf32> to vector<4x1xf32>
    %cst_21 = arith.constant dense<0.000000e+00> : vector<1xf32>
    %22 = vector.multi_reduction <add>, %21, %cst_21 [0] : vector<4x1xf32> to vector<1xf32>
    %23 = vector.shape_cast %22 : vector<1xf32> to vector<1x1xf32>
    %c0_22 = arith.constant 0 : index
    %c0_23 = arith.constant 0 : index
    %c0_24 = arith.constant 0 : index
    %24 = vector.load %arg7[%c0_22, %c0_23, %c0_24] : memref<1x2x2xf32, #tpu.memory_space<vmem>>, vector<1x2x2xf32>
    %25 = vector.shape_cast %24 : vector<1x2x2xf32> to vector<2x2xf32>
    %26 = vector.shape_cast %9 : vector<2x2xf32> to vector<1x2x2xf32>
    tpu.vector_store %arg7[%c0_22, %c0_23, %c0_24], %26 {strides = array<i32>} : memref<1x2x2xf32, #tpu.memory_space<vmem>>, vector<1x2x2xf32>,
    %c0_25 = arith.constant 0 : index
    %c0_26 = arith.constant 0 : index
    %c0_27 = arith.constant 0 : index
    %27 = vector.load %arg8[%c0_25, %c0_26, %c0_27] : memref<1x2x2xf32, #tpu.memory_space<vmem>>, vector<1x2x2xf32>
    %28 = vector.shape_cast %27 : vector<1x2x2xf32> to vector<2x2xf32>
    %29 = vector.shape_cast %11 : vector<2x2xf32> to vector<1x2x2xf32>
    tpu.vector_store %arg8[%c0_25, %c0_26, %c0_27], %29 {strides = array<i32>} : memref<1x2x2xf32, #tpu.memory_space<vmem>>, vector<1x2x2xf32>,
    %c0_28 = arith.constant 0 : index
    %c0_29 = arith.constant 0 : index
    %c0_30 = arith.constant 0 : index
    %30 = vector.load %arg9[%c0_28, %c0_29, %c0_30] : memref<1x1x1xf32, #tpu.memory_space<vmem>>, vector<1x1x1xf32>
    %31 = vector.shape_cast %30 : vector<1x1x1xf32> to vector<1x1xf32>
    %32 = vector.shape_cast %23 : vector<1x1xf32> to vector<1x1x1xf32>
    tpu.vector_store %arg9[%c0_28, %c0_29, %c0_30], %32 {strides = array<i32>} : memref<1x1x1xf32, #tpu.memory_space<vmem>>, vector<1x1x1xf32>,
    return
  }
  func.func @transform_0(%arg0: i32) -> (i32, i32) {
    %c0_i32 = arith.constant 0 : i32
    %c0_i32_0 = arith.constant 0 : i32
    %c0_i32_1 = arith.constant 0 : i32
    return %c0_i32, %c0_i32_0 : i32, i32
  }
  func.func @transform_1(%arg0: i32) -> (i32, i32) {
    %c0_i32 = arith.constant 0 : i32
    %c0_i32_0 = arith.constant 0 : i32
    %c0_i32_1 = arith.constant 0 : i32
    return %c0_i32, %c0_i32_0 : i32, i32
  }
  func.func @transform_2(%arg0: i32) -> (i32, i32) {
    %c0_i32 = arith.constant 0 : i32
    %c0_i32_0 = arith.constant 0 : i32
    %c0_i32_1 = arith.constant 0 : i32
    return %c0_i32, %c0_i32_0 : i32, i32
  }
  func.func @transform_3(%arg0: i32) -> (i32, i32) {
    %c0_i32 = arith.constant 0 : i32
    %c0_i32_0 = arith.constant 0 : i32
    %c0_i32_1 = arith.constant 0 : i32
    return %c0_i32, %c0_i32_0 : i32, i32
  }
  func.func @transform_4(%arg0: i32) -> (i32, i32, i32) {
    %c0_i32 = arith.constant 0 : i32
    %c0_i32_0 = arith.constant 0 : i32
    %c0_i32_1 = arith.constant 0 : i32
    return %arg0, %c0_i32, %c0_i32_0 : i32, i32, i32
  }
  func.func @transform_5(%arg0: i32) -> (i32, i32, i32) {
    %c0_i32 = arith.constant 0 : i32
    %c0_i32_0 = arith.constant 0 : i32
    %c0_i32_1 = arith.constant 0 : i32
    return %arg0, %c0_i32, %c0_i32_0 : i32, i32, i32
  }
  func.func @transform_6(%arg0: i32) -> (i32, i32, i32) {
    %c0_i32 = arith.constant 0 : i32
    %c0_i32_0 = arith.constant 0 : i32
    %c0_i32_1 = arith.constant 0 : i32
    return %arg0, %c0_i32, %c0_i32_0 : i32, i32, i32
  }
  func.func @transform_7(%arg0: i32) -> (i32, i32, i32) {
    %c0_i32 = arith.constant 0 : i32
    %c0_i32_0 = arith.constant 0 : i32
    %c0_i32_1 = arith.constant 0 : i32
    return %arg0, %c0_i32, %c0_i32_0 : i32, i32, i32
  }
  func.func @transform_8(%arg0: i32) -> (i32, i32, i32) {
    %c0_i32 = arith.constant 0 : i32
    %c0_i32_0 = arith.constant 0 : i32
    %c0_i32_1 = arith.constant 0 : i32
    return %arg0, %c0_i32, %c0_i32_0 : i32, i32, i32
  }
}

</mosaic_0001>

<bundles_post_ra>
// kernel: lap_loss.6
= control target key start
LH: loop header
LB: loop body
LE: loop exit
PB: predicated region body
PF: predicated region fallthrough
CT: control target
= control target key end

     0   :  { %14 = vsyncpa [#allocation3], 0  ;;  %s1317_s0 = inlined_call_operand.hbm [shape: f32[16,32], index: 0, kind: input, shape index: {}]   ;;  %s1318_s1 = inlined_call_operand.hbm [shape: f32[32,16], index: 1, kind: input, shape index: {}]   ;;  %s1319_s2 = inlined_call_operand.vmem [shape: f32[32,16], index: 2, kind: input, shape index: {}]   ;;  %s1320_s3 = inlined_call_operand.hbm [shape: f32[16,32], index: 3, kind: input, shape index: {}]   ;;  %s1321_s4 = inlined_call_operand.vmem [shape: f32[6,32,32], index: 4, kind: input, shape index: {}]   ;;  %s1322_s5 = inlined_call_operand.vmem [shape: f32[6,32,32], index: 5, kind: input, shape index: {}]   ;;  %s1323_s6 = inlined_call_operand.vmem [shape: f32[6,16,16], index: 6, kind: output, shape index: {0}]   ;;  %s1324_s7 = inlined_call_operand.vmem [shape: f32[6,16,16], index: 7, kind: output, shape index: {1}]   ;;  %s1325_s8 = inlined_call_operand.vmem [shape: f32[6,1,1], index: 8, kind: output, shape index: {2}]  }
   0x1   :  { %15 = vsyncpa [#allocation5], 0  ;;  %s1162_s27 = smov 0  }
   0x2 LB: > { %s1168_s28 = sadd.s32 4294967295, %s1110_s27   ;;  %p906_p0 = scmp.ge.s32.totalorder %s1110_s27, 1  ;;  %s1110_s27 = sphi %s1162_s27, %s21_s27  }
   0x3   : > { %p240_p1 = scmp.lt.s32.totalorder %s1110_s27, 7  ;;  %p987_p2 = scmp.eq.s32.totalorder %s1168_s28, 0 }
   0x4   : > { %s265_s9 = sshll.u32 %s1318_s1, 4  ;;  %s251_s13 = sshll.u32 %s1317_s0, 4  ;;  %s266_s9 = int_to_ptr.hbm [resolvable:$true] %s265_s9  ;;  %s252_s13 = int_to_ptr.hbm [resolvable:$true] %s251_s13 }
   0x5   : > { %p1176_p3 = pnand %p906_p0, %p240_p1  ;;  %s1112_s14 = smov [#allocation4]  }
   0x6   : > { %s267_s15 = sshll.u32 %s1112_s14, 4  ;;  %s1113_s16 = smov [#allocation2]   ;;  %s268_s15 = int_to_ptr.vmem [resolvable:$true] %s267_s15 }
   0x7   : > { %p977_p4 = pneg %p1176_p3  ;;  %s253_s17 = sshll.u32 %s1113_s16, 4  ;;  %s254_s17 = int_to_ptr.vmem [resolvable:$true] %s253_s17 }
   0x8   : > { %s282_s20 = sshll.u32 %s1320_s3, 4  ;;  %s1114_s21 = smov 128   ;;  %s283_s20 = int_to_ptr.hbm [resolvable:$true] %s282_s20 }
   0x9   : > { %p978_p5 = pnand %p987_p2, %p977_p4  ;;  %s1115_s22 = smov 8  }
   0xa   : > { %s1116_s23 = smov [#allocation6]   ;;  %316 = sbr.rel (%p1176_p3) target bundleno = 742 (0x2e6), region = 44 }
   0xb   : > { %983 = dma.hbm_to_vmem [thread:$0]  (!%p978_p5), %s266_s9, 512, %s268_s15, [#allocation5], %s1114_s21, %s1114_s21, %s1115_s22  }
   0xc   : > { %980 = dma.hbm_to_vmem [thread:$0]  (!%p978_p5), %s252_s13, 256, %s254_s17, [#allocation3], %s1114_s21, %s1114_s21, %s1115_s22  }
   0xd   : > { %s284_s24 = sshll.u32 %s1116_s23, 4  ;;  %s285_s24 = int_to_ptr.vmem [resolvable:$true] %s284_s24 }
   0xe   : > { %986 = dma.hbm_to_vmem [thread:$0]  (!%p978_p5), %s283_s20, 256, %s285_s24, [#allocation5], %s1114_s21, %s1114_s21, %s1115_s22  }
   0xf   : > { %1101 = dma.done.wait (%p987_p2), [#allocation3], 256  }
  0x10   : > { %1103 = vsyncadd (%p987_p2), [#allocation3], 4294967040 }
  0x11   : > { %1105 = dma.done.wait (%p987_p2), [#allocation5], 768  }
  0x12   : > { %1107 = vsyncadd (%p987_p2), [#allocation5], 4294966528  ;;  %p374_p6 = scmp.lt.s32.totalorder %s1168_s28, 5  ;;  %v410_v0 = vld [vmem:[#allocation4 + $0x18] sm:$0xff]  ;;  %v409_v1 = vld [vmem:[#allocation4 + $0x10] sm:$0xff]  ;;  %vm417_vm0 = vcmask 261120  }
  0x13   : > { %442 = vmatpush.msra.mxu0 %v410_v0  ;;  %512 = vmatpush.msra.mxu2 %v410_v0  ;;  %v408_v2 = vld [vmem:[#allocation4 + $0x8] sm:$0xff]  ;;  %v407_v13 = vld [vmem:[#allocation4] sm:$0xff]  ;;  %v405_v23 = vld [vmem:[#allocation2] sm:$0xff]  ;;  %vm552_vm1 = vcmask 130048   ;;  %vm746_vm2 = vcmask 0  }
  0x14   : > { %s1328_s28 = smov (!%p374_p6, %s1168_s28), 5  ;;  %957 = vmatpush.msra.mxu1 %v410_v0  ;;  %961 = vmatpush.msra.mxu3 %v410_v0  ;;  %v406_v25 = vld [vmem:[#allocation2 + $0x8] sm:$0xff]  ;;  %v411_v28 = vld [vmem:[%s1319_s2] sm:$0xff]  ;;  %v416_v30 = vld [vmem:[#allocation6 + $0x8] sm:$0xff] }
  0x15   : > { %s953_s25 = sshll.u32 %s1328_s28, 5  ;;  %443 = vmatpush.msra.mxu0 %v409_v1  ;;  %513 = vmatpush.msra.mxu2 %v409_v1  ;;  %s955_s12 = sshll.u32 %s1328_s28, 4  ;;  %v412_v31 = vld [vmem:[%s1319_s2 + $0x8] sm:$0xff]  ;;  %v413_v33 = vld [vmem:[%s1319_s2 + $0x10] sm:$0xff]  ;;  %v414_v34 = vld [vmem:[%s1319_s2 + $0x18] sm:$0xff] }
  0x16   : > { %s378_s30 = scalar_lea.vmem %s1321_s4, %s953_s25  ;;  %s383_s11 = scalar_lea.vmem %s1322_s5, %s953_s25  ;;  %958 = vmatpush.msra.mxu1 %v409_v1  ;;  %962 = vmatpush.msra.mxu3 %v409_v1  ;;  %v415_v35 = vld [vmem:[#allocation6] sm:$0xff] }
  0x17   : > { %v1211_v3 = vld [vmem:[%s378_s30] sm:$0xff]  ;;  %v1217_v6 = vld [vmem:[%s378_s30 + $0x8] sm:$0xff]  ;;  %v1221_v8 = vld [vmem:[%s378_s30 + $0x18] sm:$0xff]  ;;  %444 = vmatpush.msra.mxu0 %v408_v2  ;;  %514 = vmatpush.msra.mxu2 %v408_v2  ;;  %s388_s15 = scalar_lea.vmem %s1323_s6, %s955_s12  ;;  %s393_s20 = scalar_lea.vmem %s1324_s7, %s955_s12 }
  0x18   : > { %v1213_v4 = vld [vmem:[%s383_s11] sm:$0xff]  ;;  %v1219_v7 = vld [vmem:[%s383_s11 + $0x8] sm:$0xff]  ;;  %v1225_v10 = vld [vmem:[%s383_s11 + $0x18] sm:$0xff]  ;;  %959 = vmatpush.msra.mxu1 %v408_v2  ;;  %963 = vmatpush.msra.mxu3 %v408_v2  ;;  %s396_s9 = scalar_lea.vmem %s1325_s8, %s1328_s28 }
  0x19   : > { %v705_v5 = vsub.f32 %v1211_v3, %v1213_v4  ;;  %v706_v9 = vsub.f32 %v1217_v6, %v1219_v7  ;;  %v1227_v11 = vld [vmem:[%s378_s30 + $0x10] sm:$0xff]  ;;  %v708_v14 = vsub.f32 %v1221_v8, %v1225_v10  ;;  %445 = vmatpush.msra.mxu0 %v407_v13  ;;  %515 = vmatpush.msra.mxu2 %v407_v13 }
  0x1a   : > { %v1229_v12 = vld [vmem:[%s383_s11 + $0x10] sm:$0xff]  ;;  %923 = vmatmul.msk.f32.vlgmr.msra.gmra.mxu0 %vm417_vm0, %v1211_v3  ;;  %929 = vmatmul.msk.f32.vlgmr.msra.gmra.mxu2 %vm417_vm0, %v1213_v4 }
  0x1b   : > { %v707_v15 = vsub.f32 %v1227_v11, %v1229_v12  ;;  %960 = vmatpush.msra.mxu1 %v407_v13  ;;  %964 = vmatpush.msra.mxu3 %v407_v13 }
  0x1c   : > { %926 = vmatmul.msk.f32.vlgmr.msra.gmra.mxu1 %vm417_vm0, %v1221_v8  ;;  %932 = vmatmul.msk.f32.vlgmr.msra.gmra.mxu3 %vm417_vm0, %v1225_v10 }
  0x1d   : > { %690 = vmatpush.msrb.mxu2 %v416_v30 }
  0x1f   : > { %691 = vmatpush.msrb.mxu2 %v415_v35 }
  0x22   : > { %924 = vmatmul.msk.f32.gmra.mxu0 %vm417_vm0, %v1217_v6  ;;  %930 = vmatmul.msk.f32.gmra.mxu2 %vm417_vm0, %v1219_v7 }
  0x2a   : > { %925 = vmatmul.msk.f32.gmra.mxu0 %vm417_vm0, %v1227_v11  ;;  %931 = vmatmul.msk.f32.gmra.mxu2 %vm417_vm0, %v1229_v12 }
  0x97   : > { %v447_v16 = vpop.f32.mrf.mxu0 }
  0x99   : > { %v456_v17 = vpop.f32.mrf.mxu1 }
  0x9a   : > { %477 = vmatpush.msrb.mxu1 %v456_v17 }
  0x9d   : > { %v517_v18 = vpop.f32.mrf.mxu2 }
  0x9f   : > { %v450_v19 = vpop.f32.mrf.mxu0  ;;  %v526_v20 = vpop.f32.mrf.mxu3 }
  0xa0   : > { %541 = vmatpush.msrb.mxu3 %v526_v20 }
  0xa5   : > { %v520_v21 = vpop.f32.mrf.mxu2 }
  0xa7   : > { %v453_v22 = vpop.f32.mrf.mxu0 }
  0xa8   : > { %478 = vmatpush.msrb.mxu1 %v453_v22 }
  0xaa   : > { %479 = vmatpush.msrb.mxu1 %v450_v19 }
  0xac   : > { %480 = vmatpush.msrb.mxu1 %v447_v16 }
  0xad   : > { %v523_v24 = vpop.f32.mrf.mxu2  ;;  %927 = vmatmul.msk.f32.vlgmr.msrb.gmra.mxu1 %vm417_vm0, %v405_v23 }
  0xae   : > { %542 = vmatpush.msrb.mxu3 %v523_v24 }
  0xb0   : > { %543 = vmatpush.msrb.mxu3 %v520_v21 }
  0xb2   : > { %544 = vmatpush.msrb.mxu3 %v517_v18 }
  0xb3   : > { %933 = vmatmul.msk.f32.vlgmr.msrb.gmra.mxu3 %vm417_vm0, %v405_v23 }
  0xb4   : > { %620 = vmatpush.msra.mxu3 %v416_v30 }
  0xb5   : > { %928 = vmatmul.msk.f32.gmra.mxu1 %vm417_vm0, %v406_v25 }
  0xb6   : > { %621 = vmatpush.msra.mxu3 %v415_v35 }
  0xbb   : > { %934 = vmatmul.msk.f32.gmra.mxu3 %vm417_vm0, %v406_v25 }
 0x12a   : > { %v482_v26 = vpop.f32.mrf.mxu1 }
 0x12b   : > { %742 = vst.msk [vmem:[%s388_s15] sm:$0xff] %vm552_vm1, %v482_v26 }
 0x132   : > { %v485_v27 = vpop.f32.mrf.mxu1 }
 0x133   : > { %743 = vst.msk [vmem:[%s388_s15 + $0x8] sm:$0xff] %vm552_vm1, %v485_v27  ;;  %579 = vmatpush.msra.mxu1 %v485_v27 }
 0x135   : > { %580 = vmatpush.msra.mxu1 %v482_v26 }
 0x136   : > { %v546_v29 = vpop.f32.mrf.mxu3  ;;  %935 = vmatmul.msk.f32.vlgmr.msra.gmra.mxu1 %vm552_vm1, %v411_v28 }
 0x137   : > { %744 = vst.msk [vmem:[%s393_s20] sm:$0xff] %vm552_vm1, %v546_v29 }
 0x13e   : > { %v549_v32 = vpop.f32.mrf.mxu3  ;;  %936 = vmatmul.msk.f32.gmra.mxu1 %vm552_vm1, %v412_v31 }
 0x13f   : > { %745 = vst.msk [vmem:[%s393_s20 + $0x8] sm:$0xff] %vm552_vm1, %v549_v32  ;;  %649 = vmatpush.msrb.mxu0 %v549_v32 }
 0x141   : > { %650 = vmatpush.msrb.mxu0 %v546_v29 }
 0x142   : > { %943 = vmatmul.msk.f32.vlgmr.msrb.gmra.mxu0 %vm552_vm1, %v411_v28 }
 0x146   : > { %937 = vmatmul.msk.f32.gmra.mxu1 %vm552_vm1, %v413_v33 }
 0x14a   : > { %944 = vmatmul.msk.f32.gmra.mxu0 %vm552_vm1, %v412_v31 }
 0x14e   : > { %938 = vmatmul.msk.f32.gmra.mxu1 %vm552_vm1, %v414_v34 }
 0x152   : > { %945 = vmatmul.msk.f32.gmra.mxu0 %vm552_vm1, %v413_v33 }
 0x15a   : > { %946 = vmatmul.msk.f32.gmra.mxu0 %vm552_vm1, %v414_v34 }
 0x1b3   : > { %v582_v36 = vpop.f32.mrf.mxu1 }
 0x1b4   : > { %939 = vmatmul.msk.f32.vlgmr.msra.gmra.mxu3 %vm552_vm1, %v582_v36 }
 0x1bb   : > { %v585_v37 = vpop.f32.mrf.mxu1 }
 0x1bc   : > { %940 = vmatmul.msk.f32.gmra.mxu3 %vm552_vm1, %v585_v37 }
 0x1bf   : > { %v652_v38 = vpop.f32.mrf.mxu0 }
 0x1c0   : > { %947 = vmatmul.msk.f32.vlgmr.msrb.gmra.mxu2 %vm552_vm1, %v652_v38 }
 0x1c3   : > { %v588_v39 = vpop.f32.mrf.mxu1 }
 0x1c4   : > { %941 = vmatmul.msk.f32.gmra.mxu3 %vm552_vm1, %v588_v39 }
 0x1c7   : > { %v655_v40 = vpop.f32.mrf.mxu0 }
 0x1c8   : > { %948 = vmatmul.msk.f32.gmra.mxu2 %vm552_vm1, %v655_v40 }
 0x1cb   : > { %v591_v41 = vpop.f32.mrf.mxu1 }
 0x1cc   : > { %942 = vmatmul.msk.f32.gmra.mxu3 %vm552_vm1, %v591_v41 }
 0x1cf   : > { %v658_v42 = vpop.f32.mrf.mxu0 }
 0x1d0   : > { %949 = vmatmul.msk.f32.gmra.mxu2 %vm552_vm1, %v658_v42 }
 0x1d7   : > { %v661_v43 = vpop.f32.mrf.mxu0 }
 0x1d8   : > { %950 = vmatmul.msk.f32.gmra.mxu2 %vm552_vm1, %v661_v43 }
 0x237   : > { %v623_v44 = vpop.f32.mrf.mxu3 }
 0x23f   : > { %v626_v47 = vpop.f32.mrf.mxu3 }
 0x243   : > { %v693_v45 = vpop.f32.mrf.mxu2 }
 0x244   : > { %v709_v46 = vsub.f32 %v623_v44, %v693_v45 }
 0x246   : > { %v713_v48 = vsub.f32 %v705_v5, %v709_v46 }
 0x247   : > { %v629_v54 = vpop.f32.mrf.mxu3 }
 0x248   : > { %v717_v49 = vand.u32 2147483647, %v713_v48 }
 0x24a   : > { %v721_v50 = vsel %vm417_vm0, %v717_v49, 0.0 }
 0x24b   : > { %v696_v51 = vpop.f32.mrf.mxu2  ;;  %722 = vadd.xlane.f32.xlu0 %v721_v50 }
 0x24c   : > { %v710_v52 = vsub.f32 %v626_v47, %v696_v51 }
 0x24e   : > { %v714_v53 = vsub.f32 %v706_v9, %v710_v52 }
 0x24f   : > { %v632_v61 = vpop.f32.mrf.mxu3 }
 0x250   : > { %v718_v55 = vand.u32 2147483647, %v714_v53 }
 0x252   : > { %v724_v56 = vsel %vm417_vm0, %v718_v55, 0.0 }
 0x253   : > { %v699_v57 = vpop.f32.mrf.mxu2  ;;  %725 = vadd.xlane.f32.xlu0 %v724_v56 }
 0x254   : > { %v711_v58 = vsub.f32 %v629_v54, %v699_v57 }
 0x256   : > { %v715_v59 = vsub.f32 %v707_v15, %v711_v58 }
 0x258   : > { %v719_v60 = vand.u32 2147483647, %v715_v59 }
 0x25a   : > { %v727_v62 = vsel %vm417_vm0, %v719_v60, 0.0 }
 0x25b   : > { %v702_v63 = vpop.f32.mrf.mxu2  ;;  %728 = vadd.xlane.f32.xlu1 %v727_v62 }
 0x25c   : > { %v712_v0 = vsub.f32 %v632_v61, %v702_v63 }
 0x25e   : > { %v716_v1 = vsub.f32 %v708_v14, %v712_v0 }
 0x260   : > { %v720_v2 = vand.u32 2147483647, %v716_v1 }
 0x262   : > { %v730_v3 = vsel %vm417_vm0, %v720_v2, 0.0 }
 0x263   : > { %731 = vadd.xlane.f32.xlu1 %v730_v3 }
 0x2be   : > { %v723_v4 = vpop.xlane.xlu0 %722 }
 0x2c6   : > { %v726_v6 = vpop.xlane.xlu0 %725 }
 0x2c7   : > { %v733_v7 = vadd.f32 %v726_v6, %v723_v4 }
 0x2ce   : > { %v729_v5 = vpop.xlane.xlu1 %728 }
 0x2cf   : > { %v734_v9 = vadd.f32 %v733_v7, %v729_v5 }
 0x2d6   : > { %v732_v11 = vpop.xlane.xlu1 %731 }
 0x2d7   : > { %v735_v12 = vadd.f32 %v734_v9, %v732_v11 }
 0x2d9   : > { %v736_v13 = vrot.slane %v735_v12, 4 }
 0x2db   : > { %v737_v15 = vadd.f32 %v736_v13, %v735_v12 }
 0x2dd   : > { %v738_v16 = vrot.slane %v737_v15, 2 }
 0x2df   : > { %v739_v17 = vadd.f32 %v738_v16, %v737_v15 }
 0x2e1   : > { %v740_v18 = vrot.slane %v739_v17, 1 }
 0x2e3   : > { %v741_v8 = vadd.f32 %v740_v18, %v739_v17 }
 0x2e5   : > { %747 = vst.msk [vmem:[%s396_s9] sm:$0x1] %vm746_vm2, %v741_v8 }
 0x2e6 PF: > { %s21_s27 = sadd.s32 1, %s1110_s27  }
 0x2e7   : > { %p18_p7 = scmp.ge.s32.totalorder %s21_s27, 8  }
 0x2e9   :  { %20 = sbr.rel (!%p18_p7) target bundleno = 2 (0x2), region = 114 }
 0x2ee   :  { %797 = vsyncpa [#allocation3], 1 }
 0x2ef   :  { %799 = vsyncpa [#allocation3 + $0x1], 1 }
 0x2f0   :  { %800 = vsyncpa [#allocation5], 1 }

// kernel: lap_loss.7
= control target key start
LH: loop header
LB: loop body
LE: loop exit
PB: predicated region body
PF: predicated region fallthrough
CT: control target
= control target key end

     0   :  { %14 = vsyncpa [#allocation3], 0  ;;  %s1118_s0 = inlined_call_operand.hbm [shape: f32[8,16], index: 0, kind: input, shape index: {}]   ;;  %s1119_s1 = inlined_call_operand.hbm [shape: f32[16,8], index: 1, kind: input, shape index: {}]   ;;  %s1120_s2 = inlined_call_operand.vmem [shape: f32[16,8], index: 2, kind: input, shape index: {}]   ;;  %s1121_s3 = inlined_call_operand.hbm [shape: f32[8,16], index: 3, kind: input, shape index: {}]   ;;  %s1122_s4 = inlined_call_operand.vmem [shape: f32[6,16,16], index: 4, kind: input, shape index: {}]   ;;  %s1123_s5 = inlined_call_operand.vmem [shape: f32[6,16,16], index: 5, kind: input, shape index: {}]   ;;  %s1124_s6 = inlined_call_operand.vmem [shape: f32[6,8,8], index: 6, kind: output, shape index: {0}]   ;;  %s1125_s7 = inlined_call_operand.vmem [shape: f32[6,8,8], index: 7, kind: output, shape index: {1}]   ;;  %s1126_s8 = inlined_call_operand.vmem [shape: f32[6,1,1], index: 8, kind: output, shape index: {2}]  }
   0x1   :  { %15 = vsyncpa [#allocation5], 0  ;;  %s1021_s27 = smov 0  }
   0x2 LB: > { %s263_s30 = sshll.u32 %s1119_s1, 4  ;;  %s1030_s9 = sadd.s32 4294967295, %s969_s27   ;;  %s969_s27 = sphi %s1021_s27, %s21_s27   ;;  %s264_s30 = int_to_ptr.hbm [resolvable:$true] %s263_s30 }
   0x3   : > { %p791_p0 = scmp.ge.s32.totalorder %s969_s27, 1  ;;  %p240_p1 = scmp.lt.s32.totalorder %s969_s27, 7 }
   0x4   : > { %p846_p2 = scmp.eq.s32.totalorder %s1030_s9, 0  ;;  %s971_s11 = smov [#allocation4]  }
   0x5   : > { %p1035_p3 = pnand %p791_p0, %p240_p1  ;;  %s265_s12 = sshll.u32 %s971_s11, 4  ;;  %s266_s12 = int_to_ptr.vmem [resolvable:$true] %s265_s12 }
   0x6   : > { %s252_s15 = sshll.u32 %s1118_s0, 4  ;;  %s972_s17 = smov [#allocation2]   ;;  %s253_s15 = int_to_ptr.hbm [resolvable:$true] %s252_s15 }
   0x7   : > { %p836_p4 = pneg %p1035_p3  ;;  %s254_s18 = sshll.u32 %s972_s17, 4  ;;  %s255_s18 = int_to_ptr.vmem [resolvable:$true] %s254_s18 }
   0x8   : > { %s281_s21 = sshll.u32 %s1121_s3, 4  ;;  %s973_s22 = smov 128   ;;  %s282_s21 = int_to_ptr.hbm [resolvable:$true] %s281_s21 }
   0x9   : > { %p1046_p5 = pnand %p846_p2, %p836_p4  ;;  %s974_s23 = smov 8  }
   0xa   : > { %s975_s24 = smov [#allocation6]   ;;  %312 = sbr.rel (%p1035_p3) target bundleno = 704 (0x2c0), region = 44 }
   0xb   : > { %842 = dma.hbm_to_vmem [thread:$0]  (!%p1046_p5), %s264_s30, 256, %s266_s12, [#allocation5], %s973_s22, %s973_s22, %s974_s23  }
   0xc   : > { %839 = dma.hbm_to_vmem [thread:$0]  (!%p1046_p5), %s253_s15, 128, %s255_s18, [#allocation3]  }
   0xd   : > { %s283_s25 = sshll.u32 %s975_s24, 4  ;;  %s284_s25 = int_to_ptr.vmem [resolvable:$true] %s283_s25 }
   0xe   : > { %845 = dma.hbm_to_vmem [thread:$0]  (!%p1046_p5), %s282_s21, 128, %s284_s25, [#allocation5]  }
   0xf   : > { %960 = dma.done.wait (%p846_p2), [#allocation3], 128  }
  0x10   : > { %962 = vsyncadd (%p846_p2), [#allocation3], 4294967168 }
  0x11   : > { %964 = dma.done.wait (%p846_p2), [#allocation5], 384  }
  0x12   : > { %966 = vsyncadd (%p846_p2), [#allocation5], 4294966912  ;;  %p368_p6 = scmp.lt.s32.totalorder %s1030_s9, 5  ;;  %v395_v0 = vld [vmem:[#allocation4 + $0x8] sm:$0xff]  ;;  %v394_v1 = vld [vmem:[#allocation4] sm:$0xff]  ;;  %vm399_vm0 = vcmask 130048  }
  0x13   : > { %472 = vmatpush.msra.mxu2 %v395_v0  ;;  %420 = vmatpush.msra.mxu0 %v395_v0  ;;  %v393_v11 = vld [vmem:[#allocation2] sm:$0xff]  ;;  %v398_v13 = vld [vmem:[#allocation6] sm:$0xff]  ;;  %vm501_vm1 = vcmask 64512   ;;  %v397_v16 = vld [vmem:[%s1120_s2 + $0x8] sm:$0xff]  ;;  %vm635_vm2 = vcmask 0  }
  0x14   : > { %s1130_s9 = smov (!%p368_p6, %s1030_s9), 5  ;;  %v396_v14 = vld [vmem:[%s1120_s2] sm:$0xff] }
  0x15   : > { %s822_s26 = sshll.u32 %s1130_s9, 4  ;;  %473 = vmatpush.msra.mxu2 %v394_v1  ;;  %421 = vmatpush.msra.mxu0 %v394_v1  ;;  %s804_s13 = sshll.u32 %s1130_s9, 3 }
  0x16   : > { %s377_s30 = scalar_lea.vmem %s1123_s5, %s822_s26  ;;  %s372_s12 = scalar_lea.vmem %s1122_s4, %s822_s26 }
  0x17   : > { %v391_v2 = vld [vmem:[%s377_s30] sm:$0xff]  ;;  %v392_v3 = vld [vmem:[%s377_s30 + $0x8] sm:$0xff]  ;;  %604 = vmatpush.msrb.mxu2 %v398_v13  ;;  %s381_s16 = scalar_lea.vmem %s1124_s6, %s804_s13  ;;  %s385_s23 = scalar_lea.vmem %s1125_s7, %s804_s13 }
  0x18   : > { %v389_v4 = vld [vmem:[%s372_s12] sm:$0xff]  ;;  %v390_v5 = vld [vmem:[%s372_s12 + $0x8] sm:$0xff]  ;;  %809 = vmatmul.msk.f32.vlgmr.msra.gmra.mxu2 %vm399_vm0, %v391_v2  ;;  %s388_s26 = scalar_lea.vmem %s1126_s8, %s1130_s9 }
  0x19   : > { %v612_v6 = vsub.f32 %v389_v4, %v391_v2  ;;  %v613_v7 = vsub.f32 %v390_v5, %v392_v3  ;;  %806 = vmatmul.msk.f32.vlgmr.msra.gmra.mxu0 %vm399_vm0, %v389_v4 }
  0x20   : > { %810 = vmatmul.msk.f32.gmra.mxu2 %vm399_vm0, %v392_v3 }
  0x21   : > { %807 = vmatmul.msk.f32.gmra.mxu0 %vm399_vm0, %v390_v5 }
  0x96   : > { %v423_v8 = vpop.f32.mrf.mxu0 }
  0x9b   : > { %v475_v9 = vpop.f32.mrf.mxu2 }
  0x9e   : > { %v426_v10 = vpop.f32.mrf.mxu0 }
  0x9f   : > { %446 = vmatpush.msra.mxu1 %v426_v10 }
  0xa1   : > { %447 = vmatpush.msra.mxu1 %v423_v8 }
  0xa2   : > { %808 = vmatmul.msk.f32.vlgmr.msra.gmra.mxu1 %vm399_vm0, %v393_v11 }
  0xa3   : > { %v478_v12 = vpop.f32.mrf.mxu2 }
  0xa4   : > { %495 = vmatpush.msra.mxu3 %v478_v12 }
  0xa6   : > { %496 = vmatpush.msra.mxu3 %v475_v9 }
  0xa7   : > { %811 = vmatmul.msk.f32.vlgmr.msra.gmra.mxu3 %vm399_vm0, %v393_v11 }
  0xa8   : > { %552 = vmatpush.msrb.mxu3 %v398_v13 }
 0x11f   : > { %v449_v15 = vpop.f32.mrf.mxu1 }
 0x120   : > { %633 = vst.msk [vmem:[%s381_s16] sm:$0xff] %vm501_vm1, %v449_v15  ;;  %523 = vmatpush.msrb.mxu1 %v449_v15 }
 0x121   : > { %812 = vmatmul.msk.f32.vlgmr.msrb.gmra.mxu1 %vm501_vm1, %v396_v14 }
 0x129   : > { %813 = vmatmul.msk.f32.gmra.mxu1 %vm501_vm1, %v397_v16 }
 0x12a   : > { %v498_v17 = vpop.f32.mrf.mxu3 }
 0x12b   : > { %634 = vst.msk [vmem:[%s385_s23] sm:$0xff] %vm501_vm1, %v498_v17  ;;  %575 = vmatpush.msrb.mxu0 %v498_v17 }
 0x12c   : > { %816 = vmatmul.msk.f32.vlgmr.msrb.gmra.mxu0 %vm501_vm1, %v396_v14 }
 0x134   : > { %817 = vmatmul.msk.f32.gmra.mxu0 %vm501_vm1, %v397_v16 }
 0x19e   : > { %v525_v18 = vpop.f32.mrf.mxu1 }
 0x19f   : > { %814 = vmatmul.msk.f32.vlgmr.msrb.gmra.mxu3 %vm501_vm1, %v525_v18 }
 0x1a6   : > { %v528_v19 = vpop.f32.mrf.mxu1 }
 0x1a7   : > { %815 = vmatmul.msk.f32.gmra.mxu3 %vm501_vm1, %v528_v19 }
 0x1a9   : > { %v577_v20 = vpop.f32.mrf.mxu0 }
 0x1aa   : > { %818 = vmatmul.msk.f32.vlgmr.msrb.gmra.mxu2 %vm501_vm1, %v577_v20 }
 0x1b1   : > { %v580_v21 = vpop.f32.mrf.mxu0 }
 0x1b2   : > { %819 = vmatmul.msk.f32.gmra.mxu2 %vm501_vm1, %v580_v21 }
 0x222   : > { %v554_v22 = vpop.f32.mrf.mxu3 }
 0x22a   : > { %v557_v27 = vpop.f32.mrf.mxu3 }
 0x22d   : > { %v606_v23 = vpop.f32.mrf.mxu2 }
 0x22e   : > { %v614_v24 = vsub.f32 %v554_v22, %v606_v23 }
 0x230   : > { %v616_v25 = vsub.f32 %v612_v6, %v614_v24 }
 0x232   : > { %v618_v26 = vand.u32 2147483647, %v616_v25 }
 0x234   : > { %v620_v28 = vsel %vm399_vm0, %v618_v26, 0.0 }
 0x235   : > { %v609_v29 = vpop.f32.mrf.mxu2  ;;  %621 = vadd.xlane.f32.xlu0 %v620_v28 }
 0x236   : > { %v615_v30 = vsub.f32 %v557_v27, %v609_v29 }
 0x238   : > { %v617_v31 = vsub.f32 %v613_v7, %v615_v30 }
 0x23a   : > { %v619_v32 = vand.u32 2147483647, %v617_v31 }
 0x23c   : > { %v623_v33 = vsel %vm399_vm0, %v619_v32, 0.0 }
 0x23d   : > { %624 = vadd.xlane.f32.xlu0 %v623_v33 }
 0x2a8   : > { %v622_v34 = vpop.xlane.xlu0 %621 }
 0x2b0   : > { %v625_v35 = vpop.xlane.xlu0 %624 }
 0x2b1   : > { %v626_v36 = vadd.f32 %v625_v35, %v622_v34 }
 0x2b3   : > { %v627_v37 = vrot.slane %v626_v36, 4 }
 0x2b5   : > { %v628_v38 = vadd.f32 %v627_v37, %v626_v36 }
 0x2b7   : > { %v629_v39 = vrot.slane %v628_v38, 2 }
 0x2b9   : > { %v630_v40 = vadd.f32 %v629_v39, %v628_v38 }
 0x2bb   : > { %v631_v41 = vrot.slane %v630_v40, 1 }
 0x2bd   : > { %v632_v42 = vadd.f32 %v631_v41, %v630_v40 }
 0x2bf   : > { %636 = vst.msk [vmem:[%s388_s26] sm:$0x1] %vm635_vm2, %v632_v42 }
 0x2c0 PF: > { %s21_s27 = sadd.s32 1, %s969_s27  }
 0x2c1   : > { %p18_p7 = scmp.ge.s32.totalorder %s21_s27, 8  }
 0x2c3   :  { %20 = sbr.rel (!%p18_p7) target bundleno = 2 (0x2), region = 114 }
 0x2c8   :  { %682 = vsyncpa [#allocation3], 1 }
 0x2c9   :  { %684 = vsyncpa [#allocation3 + $0x1], 1 }
 0x2ca   :  { %685 = vsyncpa [#allocation5], 1 }

// kernel: lap_loss.5
= control target key start
LH: loop header
LB: loop body
LE: loop exit
PB: predicated region body
PF: predicated region fallthrough
CT: control target
= control target key end

     0   :  { %s2033_s0 = inlined_call_operand.hbm [shape: f32[32,64], index: 0, kind: input, shape index: {}]   ;;  %s2034_s1 = inlined_call_operand.hbm [shape: f32[64,32], index: 1, kind: input, shape index: {}]   ;;  %s2035_s2 = inlined_call_operand.hbm [shape: f32[64,32], index: 2, kind: input, shape index: {}]   ;;  %s2036_s3 = inlined_call_operand.hbm [shape: f32[32,64], index: 3, kind: input, shape index: {}]   ;;  %s2037_s4 = inlined_call_operand.hbm [shape: f32[6,64,64], index: 4, kind: input, shape index: {}]   ;;  %s2038_s5 = inlined_call_operand.hbm [shape: f32[6,64,64], index: 5, kind: input, shape index: {}]   ;;  %s2039_s6 = inlined_call_operand.vmem [shape: f32[6,32,32], index: 6, kind: output, shape index: {0}]   ;;  %s2040_s7 = inlined_call_operand.vmem [shape: f32[6,32,32], index: 7, kind: output, shape index: {1}]   ;;  %s2041_s8 = inlined_call_operand.vmem [shape: f32[6,1,1], index: 8, kind: output, shape index: {2}]  }
   0x1   :  { %2047 = sst [smem:[#allocation16_spill]] %s2033_s0 }
   0x2   :  { %2048 = sst [smem:[#allocation17_spill]] %s2034_s1 }
   0x3   :  { %2049 = sst [smem:[#allocation18_spill]] %s2035_s2 }
   0x4   :  { %2050 = sst [smem:[#allocation19_spill]] %s2037_s4 }
   0x5   :  { %14 = vsyncpa [#allocation3], 0 }
   0x6   :  { %15 = vsyncpa [#allocation5], 0 }
   0x7   :  { %16 = vsyncpa [#allocation8], 0  ;;  %s1660_s27 = smov 0   ;;  %s1662_s28 = smov 0  }
   0x8   :  { %s1664_s29 = smov 0   ;;  %s1666_s30 = smov 0  }
   0x9 LB: > { %s1679_s9 = sadd.s32 4294967295, %s1607_s30   ;;  %p126_p0 = scmp.ne.s32.totalorder %s1599_s28, %s1595_s27  ;;  %s1607_s30 = sphi %s1666_s30, %s2067_s30   ;;  %s1603_s29 = sphi %s1664_s29, %s2066_s29   ;;  %s1599_s28 = sphi %s1662_s28, %s2065_s28   ;;  %s1595_s27 = sphi %s1660_s27, %s2064_s27  }
   0xa   : > { %p127_p1 = scmp.eq.s32.totalorder %s1679_s9, 0  ;;  %p1193_p2 = scmp.ge.s32.totalorder %s1607_s30, 1 }
   0xb   : > { %p241_p3 = scmp.lt.s32.totalorder %s1607_s30, 7  ;;  %s2052_s0 = sld [smem:[#allocation16_spill]] }
   0xc   : > { %p1687_p4 = por %p127_p1, %p126_p0  ;;  %s1609_s15 = smov [#allocation2]  }
   0xd   : > { %p1694_p5 = pnand %p1193_p2, %p241_p3  ;;  %s254_s16 = sshll.u32 %s1609_s15, 4  ;;  %s255_s16 = int_to_ptr.vmem [resolvable:$true] %s254_s16 }
   0xe   : > { %s2055_s1 = sld [smem:[#allocation17_spill]]  ;;  %s2042_s21 = smov 128  }
   0xf   : > { %p1314_p6 = pneg %p1694_p5  ;;  %s2044_s22 = smov 8  }
  0x10   : > { %s1612_s23 = smov [#allocation4]   ;;  %s1720_s25 = sadd.s32 1, %s1607_s30  }
  0x11   : > { %s252_s13 = sshll.u32 %s2052_s0, 4  ;;  %p1702_p7 = pnand %p1314_p6, %p127_p1  ;;  %s253_s13 = int_to_ptr.hbm [resolvable:$true] %s252_s13 }
  0x12   : > { %s268_s24 = sshll.u32 %s1612_s23, 4  ;;  %s113_s26 = sadd.s32 1, %s1603_s29  ;;  %s269_s24 = int_to_ptr.vmem [resolvable:$true] %s268_s24 }
  0x13   : > { %1317 = dma.hbm_to_vmem [thread:$0]  (!%p1702_p7), %s253_s13, 512, %s255_s16, [#allocation3], %s2042_s21, %s2042_s21, %s2044_s22  }
  0x14   : > { %s266_s20 = sshll.u32 %s2055_s1, 4  ;;  %s110_s27 = ssub.s32 %s1607_s30, %s1720_s25  ;;  %s267_s20 = int_to_ptr.hbm [resolvable:$true] %s266_s20 }
  0x15   : > { %1320 = dma.hbm_to_vmem [thread:$0]  (!%p1702_p7), %s267_s20, 1024, %s269_s24, [#allocation5], %s2042_s21, %s2042_s21, %s2044_s22  }
  0x16   : > { %p120_p8 = scmp.ne.s32.totalorder %s1603_s29, %s1599_s28  ;;  %p111_p9 = scmp.eq.s32.totalorder %s110_s27, 0 }
  0x17   : > { %p121_p10 = scmp.eq.s32.totalorder %s1607_s30, 0  ;;  %p1338_p11 = scmp.lt.s32.totalorder %s1607_s30, 6 }
  0x18   : > { %s310_s11 = sand.u32 1, %s1607_s30   ;;  %s312_s13 = sand.u32 1, %s1603_s29  }
  0x19   : > { %s1731_s12 = scalar_select %p111_p9, %s1603_s29, %s113_s26  }
  0x1a   : > { %p122_p12 = por %p121_p10, %p120_p8  ;;  %s2046_s15 = sshll.u32 %s1607_s30, 6 }
  0x1b   : > { %2056 = sst [smem:[#allocation15_spill]] %s1731_s12  ;;  %s1735_s16 = sshll.u32 %s312_s13, 6 }
  0x1c   : > { %s2057_s4 = sld [smem:[#allocation19_spill]]  ;;  %s314_s24 = scalar_lea.vmem [#allocation9], %s1735_s16 }
  0x1d   : > { %s322_s27 = sshll.u32 %s314_s24, 4  ;;  %p1745_p13 = pnand %p1338_p11, %p122_p12  ;;  %s323_s27 = int_to_ptr.vmem [resolvable:$true] %s322_s27 }
  0x1e   : > { %s2059_s2 = sld [smem:[#allocation18_spill]]  ;;  %s1752_s18 = scalar_lea.sflag [#allocation3], %s310_s11 }
  0x1f   : > { %p1445_p2 = pneg %p1745_p13 }
  0x22   : > { %s319_s20 = scalar_lea.hbm %s2057_s4, %s2046_s15  ;;  %s1448_s21 = scalar_lea.hbm %s2057_s4, 384 }
  0x23   : > { %s320_s23 = sshll.u32 %s319_s20, 4  ;;  %s321_s23 = int_to_ptr.hbm [resolvable:$true] %s320_s23 }
  0x24   : > { %s280_s13 = sshll.u32 %s2059_s2, 4  ;;  %s1441_s19 = sshra.s32 %s321_s23, 4  ;;  %s281_s13 = int_to_ptr.hbm [resolvable:$true] %s280_s13  ;;  %s1442_s19 = int_to_ptr.hbm [resolvable:$true] %s1441_s19 }
  0x25   : > { %s1443_s20 = scalar_lea.hbm %s1442_s19, 64  ;;  %p1449_p8 = scmp.lt.s32.totalorder %s1442_s19, %s2057_s4 }
  0x26   : > { %p1444_p0 = scmp.ne.s32.totalorder %s1442_s19, %s1443_s20  ;;  %p1450_p9 = scmp.lt.s32.totalorder %s1448_s21, %s1443_s20 }
  0x28   : > { %p1446_p3 = pnand %p1445_p2, %p1444_p0  ;;  %p1451_p10 = por %p1450_p9, %p1449_p8 }
  0x2a   : > { %p1447_p6 = pneg %p1446_p3 }
  0x2c   : > { %p1452_p11 = pnand %p1451_p10, %p1447_p6 }
  0x2e   : > { %1455 = shalt.err (!%p1452_p11)
}
  0x2f   : > { %s2060_s11 = smov 8   ;;  %s2061_s1 = smov 128  }
  0x30   : > { %1330 = dma.hbm_to_vmem [thread:$0]  (!%p1745_p13), %s321_s23, 1024, %s323_s27, %s1752_s18, %s2061_s1, %s2061_s1, %s2060_s11  }
  0x31   : > { %s1613_s15 = smov [#allocation6]   ;;  %s294_s19 = sshll.u32 %s2036_s3, 4  ;;  %s295_s19 = int_to_ptr.hbm [resolvable:$true] %s294_s19 }
  0x32   : > { %s282_s24 = sshll.u32 %s1613_s15, 4  ;;  %s1614_s20 = smov [#allocation7]   ;;  %s283_s24 = int_to_ptr.vmem [resolvable:$true] %s282_s24 }
  0x33   : > { %1323 = dma.hbm_to_vmem [thread:$0]  (!%p1702_p7), %s281_s13, 1024, %s283_s24, [#allocation5], %s2061_s1, %s2061_s1, %s2060_s11  }
  0x34   : > { %s296_s21 = sshll.u32 %s1614_s20, 4  ;;  %s2062_s22 = sshll.u32 %s1607_s30, 6  ;;  %s297_s21 = int_to_ptr.vmem [resolvable:$true] %s296_s21 }
  0x35   : > { %s341_s23 = scalar_lea.hbm %s2038_s5, %s2062_s22  ;;  %s336_s2 = scalar_lea.vmem [#allocation10], %s1735_s16 }
  0x36   : > { %s342_s27 = sshll.u32 %s341_s23, 4  ;;  %s344_s15 = sshll.u32 %s336_s2, 4  ;;  %s343_s27 = int_to_ptr.hbm [resolvable:$true] %s342_s27  ;;  %s345_s15 = int_to_ptr.vmem [resolvable:$true] %s344_s15 }
  0x37   : > { %1326 = dma.hbm_to_vmem [thread:$0]  (!%p1702_p7), %s295_s19, 512, %s297_s21, [#allocation8], %s2061_s1, %s2061_s1, %s2060_s11  }
  0x38   : > { %s1531_s0 = sshra.s32 %s343_s27, 4  ;;  %s1538_s17 = scalar_lea.hbm %s2038_s5, 384  ;;  %s1532_s0 = int_to_ptr.hbm [resolvable:$true] %s1531_s0 }
  0x39   : > { %s1533_s13 = scalar_lea.hbm %s1532_s0, 64  ;;  %p1539_p7 = scmp.lt.s32.totalorder %s1532_s0, %s2038_s5 }
  0x3a   : > { %p1534_p12 = scmp.ne.s32.totalorder %s1532_s0, %s1533_s13  ;;  %p1540_p6 = scmp.lt.s32.totalorder %s1538_s17, %s1533_s13 }
  0x3c   : > { %p1536_p0 = pnand %p1534_p12, %p1445_p2  ;;  %p1541_p8 = por %p1540_p6, %p1539_p7 }
  0x3e   : > { %p1537_p3 = pneg %p1536_p0 }
  0x40   : > { %p1542_p9 = pnand %p1541_p8, %p1537_p3 }
  0x42   : > { %1545 = shalt.err (!%p1542_p9)
}
  0x43   : > { %1333 = dma.hbm_to_vmem [thread:$0]  (!%p1745_p13), %s343_s27, 1024, %s345_s15, %s1752_s18, %s2061_s1, %s2061_s1, %s2060_s11  }
  0x44   : > { %356 = sbr.rel (%p1694_p5) target bundleno = 896 (0x380), region = 44 }
  0x49   : > { %1578 = dma.done.wait (%p127_p1), [#allocation3], 512  }
  0x4a   : > { %1580 = vsyncadd (%p127_p1), [#allocation3], 4294966784 }
  0x4b   : > { %1582 = dma.done.wait (%p127_p1), [#allocation5], 2048  }
  0x4c   : > { %1584 = vsyncadd (%p127_p1), [#allocation5], 4294965248 }
  0x4d   : > { %1586 = dma.done.wait (%p127_p1), [#allocation8], 512  }
  0x4e   : > { %1588 = vsyncadd (%p127_p1), [#allocation8], 4294966784  ;;  %s378_s1 = sand.u32 1, %s1679_s9   ;;  %s380_s14 = sand.u32 1, %s1599_s28  }
  0x4f   : > { %s1210_s16 = sshll.u32 %s380_s14, 6  ;;  %s379_s26 = scalar_lea.sflag [#allocation3], %s378_s1 }
  0x50   : > { %s1821_s18 = scalar_lea.vmem [#allocation9], %s1210_s16 }
  0x51   : > { %1590 = dma.done.wait (%p1687_p4), %s379_s26, 2048  }
  0x52   : > { %1592 = vsyncadd (%p1687_p4), %s379_s26, 4294965248  ;;  %v479_v0 = vld [vmem:[#allocation4 + $0x38] sm:$0xff]  ;;  %v478_v1 = vld [vmem:[#allocation4 + $0x30] sm:$0xff]  ;;  %s1830_s11 = scalar_lea.vmem [#allocation10], %s1210_s16  ;;  %vm492_vm0 = vcmask 523264   ;;  %p439_p1 = scmp.lt.s32.totalorder %s1679_s9, 5 }
  0x53   : > { %525 = vmatpush.msra.mxu0 %v479_v0  ;;  %631 = vmatpush.msra.mxu2 %v479_v0  ;;  %v477_v2 = vld [vmem:[#allocation4 + $0x28] sm:$0xff]  ;;  %v1828_v3 = vld [vmem:[%s1821_s18] sm:$0xff]  ;;  %v1846_v10 = vld [vmem:[%s1821_s18 + $0x10] sm:$0xff]  ;;  %vm693_vm1 = vcmask 261120   ;;  %vm1007_vm2 = vcmask 0  }
  0x54   : > { %1286 = vmatpush.msra.mxu3 %v479_v0  ;;  %1278 = vmatpush.msra.mxu1 %v479_v0  ;;  %v1833_v4 = vld [vmem:[%s1830_s11] sm:$0xff]  ;;  %v1836_v5 = vld [vmem:[%s1821_s18 + $0x8] sm:$0xff]  ;;  %v1849_v11 = vld [vmem:[%s1830_s11 + $0x10] sm:$0xff]  ;;  %s2069_s9 = smov (!%p439_p1, %s1679_s9), 5 }
  0x55   : > { %526 = vmatpush.msra.mxu0 %v478_v1  ;;  %632 = vmatpush.msra.mxu2 %v478_v1  ;;  %v1839_v6 = vld [vmem:[%s1830_s11 + $0x8] sm:$0xff]  ;;  %v476_v7 = vld [vmem:[#allocation4 + $0x20] sm:$0xff]  ;;  %v930_v8 = vsub.f32 %v1828_v3, %v1833_v4  ;;  %v932_v12 = vsub.f32 %v1846_v10, %v1849_v11  ;;  %v475_v13 = vld [vmem:[#allocation4 + $0x18] sm:$0xff]  ;;  %s1276_s10 = sshll.u32 %s2069_s9, 5  ;;  %s451_s0 = scalar_lea.vmem %s2041_s8, %s2069_s9 }
  0x56   : > { %1287 = vmatpush.msra.mxu3 %v478_v1  ;;  %v931_v9 = vsub.f32 %v1836_v5, %v1839_v6  ;;  %1279 = vmatpush.msra.mxu1 %v478_v1  ;;  %v1854_v14 = vld [vmem:[%s1821_s18 + $0x18] sm:$0xff]  ;;  %v474_v16 = vld [vmem:[#allocation4 + $0x10] sm:$0xff]  ;;  %v473_v21 = vld [vmem:[#allocation4 + $0x8] sm:$0xff]  ;;  %s443_s21 = scalar_lea.vmem %s2039_s6, %s1276_s10  ;;  %s448_s27 = scalar_lea.vmem %s2040_s7, %s1276_s10 }
  0x57   : > { %527 = vmatpush.msra.mxu0 %v477_v2  ;;  %633 = vmatpush.msra.mxu2 %v477_v2  ;;  %v1857_v15 = vld [vmem:[%s1830_s11 + $0x18] sm:$0xff]  ;;  %v1860_v17 = vld [vmem:[%s1830_s11 + $0x30] sm:$0xff]  ;;  %v472_v22 = vld [vmem:[#allocation4] sm:$0xff] }
  0x58   : > { %1288 = vmatpush.msra.mxu3 %v477_v2  ;;  %1280 = vmatpush.msra.mxu1 %v477_v2  ;;  %v933_v18 = vsub.f32 %v1854_v14, %v1857_v15  ;;  %v1865_v19 = vld [vmem:[%s1821_s18 + $0x30] sm:$0xff]  ;;  %v1870_v23 = vld [vmem:[%s1821_s18 + $0x20] sm:$0xff]  ;;  %v1880_v25 = vld [vmem:[%s1830_s11 + $0x38] sm:$0xff] }
  0x59   : > { %528 = vmatpush.msra.mxu0 %v476_v7  ;;  %634 = vmatpush.msra.mxu2 %v476_v7  ;;  %v936_v20 = vsub.f32 %v1865_v19, %v1860_v17  ;;  %v1873_v24 = vld [vmem:[%s1830_s11 + $0x20] sm:$0xff]  ;;  %v1885_v27 = vld [vmem:[%s1821_s18 + $0x38] sm:$0xff]  ;;  %v1894_v29 = vld [vmem:[%s1821_s18 + $0x28] sm:$0xff] }
  0x5a   : > { %1289 = vmatpush.msra.mxu3 %v476_v7  ;;  %1281 = vmatpush.msra.mxu1 %v476_v7  ;;  %v934_v26 = vsub.f32 %v1870_v23, %v1873_v24  ;;  %v937_v28 = vsub.f32 %v1885_v27, %v1880_v25  ;;  %v1897_v30 = vld [vmem:[%s1830_s11 + $0x28] sm:$0xff]  ;;  %v468_v48 = vld [vmem:[#allocation2] sm:$0xff]  ;;  %v470_v50 = vld [vmem:[#allocation2 + $0x10] sm:$0xff] }
  0x5b   : > { %529 = vmatpush.msra.mxu0 %v475_v13  ;;  %635 = vmatpush.msra.mxu2 %v475_v13  ;;  %v935_v31 = vsub.f32 %v1894_v29, %v1897_v30  ;;  %v469_v49 = vld [vmem:[#allocation2 + $0x8] sm:$0xff]  ;;  %v471_v51 = vld [vmem:[#allocation2 + $0x18] sm:$0xff]  ;;  %v480_v59 = vld [vmem:[#allocation6] sm:$0xff] }
  0x5c   : > { %1290 = vmatpush.msra.mxu3 %v475_v13  ;;  %1282 = vmatpush.msra.mxu1 %v475_v13  ;;  %v481_v61 = vld [vmem:[#allocation6 + $0x8] sm:$0xff]  ;;  %v482_v62 = vld [vmem:[#allocation6 + $0x10] sm:$0xff]  ;;  %v483_v63 = vld [vmem:[#allocation6 + $0x18] sm:$0xff] }
  0x5d   : > { %530 = vmatpush.msra.mxu0 %v474_v16  ;;  %636 = vmatpush.msra.mxu2 %v474_v16  ;;  %v484_v0 = vld [vmem:[#allocation6 + $0x20] sm:$0xff]  ;;  %v491_v1 = vld [vmem:[#allocation7 + $0x18] sm:$0xff]  ;;  %v490_v2 = vld [vmem:[#allocation7 + $0x10] sm:$0xff] }
  0x5e   : > { %1291 = vmatpush.msra.mxu3 %v474_v16  ;;  %1283 = vmatpush.msra.mxu1 %v474_v16  ;;  %v485_v7 = vld [vmem:[#allocation6 + $0x28] sm:$0xff]  ;;  %v486_v16 = vld [vmem:[#allocation6 + $0x30] sm:$0xff] }
  0x5f   : > { %531 = vmatpush.msra.mxu0 %v473_v21  ;;  %637 = vmatpush.msra.mxu2 %v473_v21  ;;  %v489_v13 = vld [vmem:[#allocation7 + $0x8] sm:$0xff] }
  0x60   : > { %1292 = vmatpush.msra.mxu3 %v473_v21  ;;  %1284 = vmatpush.msra.mxu1 %v473_v21  ;;  %v487_v21 = vld [vmem:[#allocation6 + $0x38] sm:$0xff] }
  0x61   : > { %532 = vmatpush.msra.mxu0 %v472_v22  ;;  %638 = vmatpush.msra.mxu2 %v472_v22 }
  0x62   : > { %1216 = vmatmul.msk.f32.vlgmr.msra.gmra.mxu0 %vm492_vm0, %v1828_v3  ;;  %1228 = vmatmul.msk.f32.vlgmr.msra.gmra.mxu2 %vm492_vm0, %v1833_v4 }
  0x63   : > { %1293 = vmatpush.msra.mxu3 %v472_v22  ;;  %1285 = vmatpush.msra.mxu1 %v472_v22  ;;  %v488_v22 = vld [vmem:[#allocation7] sm:$0xff] }
  0x64   : > { %1234 = vmatmul.msk.f32.vlgmr.msra.gmra.mxu3 %vm492_vm0, %v1860_v17  ;;  %1222 = vmatmul.msk.f32.vlgmr.msra.gmra.mxu1 %vm492_vm0, %v1865_v19 }
  0x65   : > { %901 = vmatpush.msrb.mxu2 %v491_v1 }
  0x67   : > { %902 = vmatpush.msrb.mxu2 %v490_v2 }
  0x69   : > { %903 = vmatpush.msrb.mxu2 %v489_v13 }
  0x6a   : > { %1217 = vmatmul.msk.f32.gmra.mxu0 %vm492_vm0, %v1836_v5  ;;  %1229 = vmatmul.msk.f32.gmra.mxu2 %vm492_vm0, %v1839_v6 }
  0x6b   : > { %904 = vmatpush.msrb.mxu2 %v488_v22 }
  0x6c   : > { %1235 = vmatmul.msk.f32.gmra.mxu3 %vm492_vm0, %v1880_v25  ;;  %1223 = vmatmul.msk.f32.gmra.mxu1 %vm492_vm0, %v1885_v27 }
  0x72   : > { %1218 = vmatmul.msk.f32.gmra.mxu0 %vm492_vm0, %v1846_v10  ;;  %1230 = vmatmul.msk.f32.gmra.mxu2 %vm492_vm0, %v1849_v11 }
  0x7a   : > { %1219 = vmatmul.msk.f32.gmra.mxu0 %vm492_vm0, %v1854_v14  ;;  %1231 = vmatmul.msk.f32.gmra.mxu2 %vm492_vm0, %v1857_v15 }
  0x82   : > { %1220 = vmatmul.msk.f32.gmra.mxu0 %vm492_vm0, %v1870_v23  ;;  %1232 = vmatmul.msk.f32.gmra.mxu2 %vm492_vm0, %v1873_v24 }
  0x8a   : > { %1221 = vmatmul.msk.f32.gmra.mxu0 %vm492_vm0, %v1894_v29  ;;  %1233 = vmatmul.msk.f32.gmra.mxu2 %vm492_vm0, %v1897_v30 }
  0xdf   : > { %v534_v32 = vpop.f32.mrf.mxu0 }
  0xe1   : > { %v552_v33 = vpop.f32.mrf.mxu1 }
  0xe5   : > { %v640_v34 = vpop.f32.mrf.mxu2 }
  0xe7   : > { %v537_v35 = vpop.f32.mrf.mxu0  ;;  %v658_v36 = vpop.f32.mrf.mxu3 }
  0xe9   : > { %v555_v37 = vpop.f32.mrf.mxu1 }
  0xea   : > { %578 = vmatpush.msrb.mxu1 %v555_v37 }
  0xec   : > { %579 = vmatpush.msrb.mxu1 %v552_v33 }
  0xed   : > { %v643_v38 = vpop.f32.mrf.mxu2 }
  0xef   : > { %v540_v39 = vpop.f32.mrf.mxu0  ;;  %v661_v40 = vpop.f32.mrf.mxu3 }
  0xf0   : > { %672 = vmatpush.msrb.mxu3 %v661_v40 }
  0xf2   : > { %673 = vmatpush.msrb.mxu3 %v658_v36 }
  0xf5   : > { %v646_v41 = vpop.f32.mrf.mxu2 }
  0xf7   : > { %v543_v42 = vpop.f32.mrf.mxu0 }
  0xfd   : > { %v649_v43 = vpop.f32.mrf.mxu2 }
  0xff   : > { %v546_v44 = vpop.f32.mrf.mxu0 }
 0x105   : > { %v652_v45 = vpop.f32.mrf.mxu2 }
 0x107   : > { %v549_v46 = vpop.f32.mrf.mxu0 }
 0x108   : > { %580 = vmatpush.msrb.mxu1 %v549_v46 }
 0x10a   : > { %581 = vmatpush.msrb.mxu1 %v546_v44 }
 0x10c   : > { %582 = vmatpush.msrb.mxu1 %v543_v42 }
 0x10d   : > { %v655_v47 = vpop.f32.mrf.mxu2 }
 0x10e   : > { %583 = vmatpush.msrb.mxu1 %v540_v39  ;;  %674 = vmatpush.msrb.mxu3 %v655_v47 }
 0x110   : > { %584 = vmatpush.msrb.mxu1 %v537_v35  ;;  %675 = vmatpush.msrb.mxu3 %v652_v45 }
 0x112   : > { %585 = vmatpush.msrb.mxu1 %v534_v32  ;;  %676 = vmatpush.msrb.mxu3 %v649_v43 }
 0x113   : > { %1224 = vmatmul.msk.f32.vlgmr.msrb.gmra.mxu1 %vm492_vm0, %v468_v48 }
 0x114   : > { %677 = vmatpush.msrb.mxu3 %v646_v41 }
 0x116   : > { %678 = vmatpush.msrb.mxu3 %v643_v38 }
 0x118   : > { %679 = vmatpush.msrb.mxu3 %v640_v34 }
 0x119   : > { %1236 = vmatmul.msk.f32.vlgmr.msrb.gmra.mxu3 %vm492_vm0, %v468_v48 }
 0x11a   : > { %795 = vmatpush.msra.mxu3 %v491_v1 }
 0x11b   : > { %1225 = vmatmul.msk.f32.gmra.mxu1 %vm492_vm0, %v469_v49 }
 0x11c   : > { %796 = vmatpush.msra.mxu3 %v490_v2 }
 0x11e   : > { %797 = vmatpush.msra.mxu3 %v489_v13 }
 0x120   : > { %798 = vmatpush.msra.mxu3 %v488_v22 }
 0x121   : > { %1237 = vmatmul.msk.f32.gmra.mxu3 %vm492_vm0, %v469_v49 }
 0x123   : > { %1226 = vmatmul.msk.f32.gmra.mxu1 %vm492_vm0, %v470_v50 }
 0x129   : > { %1238 = vmatmul.msk.f32.gmra.mxu3 %vm492_vm0, %v470_v50 }
 0x12b   : > { %1227 = vmatmul.msk.f32.gmra.mxu1 %vm492_vm0, %v471_v51 }
 0x131   : > { %1239 = vmatmul.msk.f32.gmra.mxu3 %vm492_vm0, %v471_v51 }
 0x190   : > { %v587_v52 = vpop.f32.mrf.mxu1 }
 0x191   : > { %999 = vst.msk [vmem:[%s443_s21] sm:$0xff] %vm693_vm1, %v587_v52 }
 0x198   : > { %v590_v53 = vpop.f32.mrf.mxu1 }
 0x199   : > { %1000 = vst.msk [vmem:[%s443_s21 + $0x8] sm:$0xff] %vm693_vm1, %v590_v53 }
 0x19c   : > { %v681_v54 = vpop.f32.mrf.mxu3 }
 0x19d   : > { %1003 = vst.msk [vmem:[%s448_s27] sm:$0xff] %vm693_vm1, %v681_v54 }
 0x1a0   : > { %v593_v55 = vpop.f32.mrf.mxu1 }
 0x1a1   : > { %1001 = vst.msk [vmem:[%s443_s21 + $0x10] sm:$0xff] %vm693_vm1, %v593_v55 }
 0x1a4   : > { %v684_v56 = vpop.f32.mrf.mxu3 }
 0x1a5   : > { %1004 = vst.msk [vmem:[%s448_s27 + $0x8] sm:$0xff] %vm693_vm1, %v684_v56 }
 0x1a8   : > { %v596_v57 = vpop.f32.mrf.mxu1 }
 0x1a9   : > { %1002 = vst.msk [vmem:[%s443_s21 + $0x18] sm:$0xff] %vm693_vm1, %v596_v57  ;;  %730 = vmatpush.msra.mxu1 %v596_v57 }
 0x1ab   : > { %731 = vmatpush.msra.mxu1 %v593_v55 }
 0x1ac   : > { %v687_v58 = vpop.f32.mrf.mxu3 }
 0x1ad   : > { %1005 = vst.msk [vmem:[%s448_s27 + $0x10] sm:$0xff] %vm693_vm1, %v687_v58  ;;  %732 = vmatpush.msra.mxu1 %v590_v53 }
 0x1af   : > { %733 = vmatpush.msra.mxu1 %v587_v52 }
 0x1b0   : > { %1240 = vmatmul.msk.f32.vlgmr.msra.gmra.mxu1 %vm693_vm1, %v480_v59 }
 0x1b4   : > { %v690_v60 = vpop.f32.mrf.mxu3 }
 0x1b5   : > { %1006 = vst.msk [vmem:[%s448_s27 + $0x18] sm:$0xff] %vm693_vm1, %v690_v60  ;;  %836 = vmatpush.msrb.mxu0 %v690_v60 }
 0x1b7   : > { %837 = vmatpush.msrb.mxu0 %v687_v58 }
 0x1b8   : > { %1241 = vmatmul.msk.f32.gmra.mxu1 %vm693_vm1, %v481_v61 }
 0x1b9   : > { %838 = vmatpush.msrb.mxu0 %v684_v56 }
 0x1bb   : > { %839 = vmatpush.msrb.mxu0 %v681_v54 }
 0x1bc   : > { %1256 = vmatmul.msk.f32.vlgmr.msrb.gmra.mxu0 %vm693_vm1, %v480_v59 }
 0x1c0   : > { %1242 = vmatmul.msk.f32.gmra.mxu1 %vm693_vm1, %v482_v62 }
 0x1c4   : > { %1257 = vmatmul.msk.f32.gmra.mxu0 %vm693_vm1, %v481_v61 }
 0x1c8   : > { %1243 = vmatmul.msk.f32.gmra.mxu1 %vm693_vm1, %v483_v63 }
 0x1cc   : > { %1258 = vmatmul.msk.f32.gmra.mxu0 %vm693_vm1, %v482_v62 }
 0x1d0   : > { %1244 = vmatmul.msk.f32.gmra.mxu1 %vm693_vm1, %v484_v0 }
 0x1d4   : > { %1259 = vmatmul.msk.f32.gmra.mxu0 %vm693_vm1, %v483_v63 }
 0x1d8   : > { %1245 = vmatmul.msk.f32.gmra.mxu1 %vm693_vm1, %v485_v7 }
 0x1dc   : > { %1260 = vmatmul.msk.f32.gmra.mxu0 %vm693_vm1, %v484_v0 }
 0x1e0   : > { %1246 = vmatmul.msk.f32.gmra.mxu1 %vm693_vm1, %v486_v16 }
 0x1e4   : > { %1261 = vmatmul.msk.f32.gmra.mxu0 %vm693_vm1, %v485_v7 }
 0x1e8   : > { %1247 = vmatmul.msk.f32.gmra.mxu1 %vm693_vm1, %v487_v21 }
 0x1ec   : > { %1262 = vmatmul.msk.f32.gmra.mxu0 %vm693_vm1, %v486_v16 }
 0x1f4   : > { %1263 = vmatmul.msk.f32.gmra.mxu0 %vm693_vm1, %v487_v21 }
 0x22d   : > { %v735_v32 = vpop.f32.mrf.mxu1 }
 0x22e   : > { %1248 = vmatmul.msk.f32.vlgmr.msra.gmra.mxu3 %vm693_vm1, %v735_v32 }
 0x235   : > { %v738_v33 = vpop.f32.mrf.mxu1 }
 0x236   : > { %1249 = vmatmul.msk.f32.gmra.mxu3 %vm693_vm1, %v738_v33 }
 0x239   : > { %v841_v34 = vpop.f32.mrf.mxu0 }
 0x23a   : > { %1264 = vmatmul.msk.f32.vlgmr.msrb.gmra.mxu2 %vm693_vm1, %v841_v34 }
 0x23d   : > { %v741_v35 = vpop.f32.mrf.mxu1 }
 0x23e   : > { %1250 = vmatmul.msk.f32.gmra.mxu3 %vm693_vm1, %v741_v35 }
 0x241   : > { %v844_v36 = vpop.f32.mrf.mxu0 }
 0x242   : > { %1265 = vmatmul.msk.f32.gmra.mxu2 %vm693_vm1, %v844_v36 }
 0x245   : > { %v744_v37 = vpop.f32.mrf.mxu1 }
 0x246   : > { %1251 = vmatmul.msk.f32.gmra.mxu3 %vm693_vm1, %v744_v37 }
 0x249   : > { %v847_v38 = vpop.f32.mrf.mxu0 }
 0x24a   : > { %1266 = vmatmul.msk.f32.gmra.mxu2 %vm693_vm1, %v847_v38 }
 0x24d   : > { %v747_v39 = vpop.f32.mrf.mxu1 }
 0x24e   : > { %1252 = vmatmul.msk.f32.gmra.mxu3 %vm693_vm1, %v747_v39 }
 0x251   : > { %v850_v40 = vpop.f32.mrf.mxu0 }
 0x252   : > { %1267 = vmatmul.msk.f32.gmra.mxu2 %vm693_vm1, %v850_v40 }
 0x255   : > { %v750_v41 = vpop.f32.mrf.mxu1 }
 0x256   : > { %1253 = vmatmul.msk.f32.gmra.mxu3 %vm693_vm1, %v750_v41 }
 0x259   : > { %v853_v42 = vpop.f32.mrf.mxu0 }
 0x25a   : > { %1268 = vmatmul.msk.f32.gmra.mxu2 %vm693_vm1, %v853_v42 }
 0x25d   : > { %v753_v43 = vpop.f32.mrf.mxu1 }
 0x25e   : > { %1254 = vmatmul.msk.f32.gmra.mxu3 %vm693_vm1, %v753_v43 }
 0x261   : > { %v856_v44 = vpop.f32.mrf.mxu0 }
 0x262   : > { %1269 = vmatmul.msk.f32.gmra.mxu2 %vm693_vm1, %v856_v44 }
 0x265   : > { %v756_v45 = vpop.f32.mrf.mxu1 }
 0x266   : > { %1255 = vmatmul.msk.f32.gmra.mxu3 %vm693_vm1, %v756_v45 }
 0x269   : > { %v859_v46 = vpop.f32.mrf.mxu0 }
 0x26a   : > { %1270 = vmatmul.msk.f32.gmra.mxu2 %vm693_vm1, %v859_v46 }
 0x271   : > { %v862_v47 = vpop.f32.mrf.mxu0 }
 0x272   : > { %1271 = vmatmul.msk.f32.gmra.mxu2 %vm693_vm1, %v862_v47 }
 0x2b1   : > { %v800_v48 = vpop.f32.mrf.mxu3 }
 0x2b9   : > { %v803_v49 = vpop.f32.mrf.mxu3 }
 0x2bd   : > { %v906_v50 = vpop.f32.mrf.mxu2 }
 0x2be   : > { %v938_v51 = vsub.f32 %v800_v48, %v906_v50 }
 0x2c0   : > { %v946_v52 = vsub.f32 %v930_v8, %v938_v51 }
 0x2c1   : > { %v806_v53 = vpop.f32.mrf.mxu3 }
 0x2c2   : > { %v954_v54 = vand.u32 2147483647, %v946_v52 }
 0x2c4   : > { %v962_v55 = vsel %vm492_vm0, %v954_v54, 0.0 }
 0x2c5   : > { %v909_v56 = vpop.f32.mrf.mxu2  ;;  %963 = vadd.xlane.f32.xlu0 %v962_v55 }
 0x2c6   : > { %v939_v57 = vsub.f32 %v803_v49, %v909_v56 }
 0x2c8   : > { %v947_v58 = vsub.f32 %v931_v9, %v939_v57 }
 0x2c9   : > { %v809_v60 = vpop.f32.mrf.mxu3 }
 0x2ca   : > { %v955_v59 = vand.u32 2147483647, %v947_v58 }
 0x2cc   : > { %v965_v61 = vsel %vm492_vm0, %v955_v59, 0.0 }
 0x2cd   : > { %v912_v62 = vpop.f32.mrf.mxu2  ;;  %966 = vadd.xlane.f32.xlu0 %v965_v61 }
 0x2ce   : > { %v940_v63 = vsub.f32 %v806_v53, %v912_v62 }
 0x2d0   : > { %v948_v3 = vsub.f32 %v932_v12, %v940_v63 }
 0x2d1   : > { %v812_v1 = vpop.f32.mrf.mxu3 }
 0x2d2   : > { %v956_v4 = vand.u32 2147483647, %v948_v3 }
 0x2d4   : > { %v968_v8 = vsel %vm492_vm0, %v956_v4, 0.0 }
 0x2d5   : > { %v915_v0 = vpop.f32.mrf.mxu2  ;;  %969 = vadd.xlane.f32.xlu1 %v968_v8 }
 0x2d6   : > { %v941_v2 = vsub.f32 %v809_v60, %v915_v0 }
 0x2d8   : > { %v949_v5 = vsub.f32 %v933_v18, %v941_v2 }
 0x2d9   : > { %v815_v16 = vpop.f32.mrf.mxu3 }
 0x2da   : > { %v957_v6 = vand.u32 2147483647, %v949_v5 }
 0x2dc   : > { %v971_v9 = vsel %vm492_vm0, %v957_v6, 0.0 }
 0x2dd   : > { %v918_v7 = vpop.f32.mrf.mxu2  ;;  %972 = vadd.xlane.f32.xlu1 %v971_v9 }
 0x2de   : > { %v942_v13 = vsub.f32 %v812_v1, %v918_v7 }
 0x2e0   : > { %v950_v10 = vsub.f32 %v934_v26, %v942_v13 }
 0x2e1   : > { %v818_v15 = vpop.f32.mrf.mxu3 }
 0x2e2   : > { %v958_v11 = vand.u32 2147483647, %v950_v10 }
 0x2e4   : > { %v974_v12 = vsel %vm492_vm0, %v958_v11, 0.0 }
 0x2e5   : > { %v921_v21 = vpop.f32.mrf.mxu2  ;;  %975 = vadd.xlane.f32.xlu2 %v974_v12 }
 0x2e6   : > { %v943_v22 = vsub.f32 %v815_v16, %v921_v21 }
 0x2e8   : > { %v951_v14 = vsub.f32 %v935_v31, %v943_v22 }
 0x2e9   : > { %v821_v26 = vpop.f32.mrf.mxu3 }
 0x2ea   : > { %v959_v18 = vand.u32 2147483647, %v951_v14 }
 0x2ec   : > { %v977_v32 = vsel %vm492_vm0, %v959_v18, 0.0 }
 0x2ed   : > { %v924_v33 = vpop.f32.mrf.mxu2  ;;  %978 = vadd.xlane.f32.xlu2 %v977_v32 }
 0x2ee   : > { %v944_v34 = vsub.f32 %v818_v15, %v924_v33 }
 0x2f0   : > { %v952_v23 = vsub.f32 %v936_v20, %v944_v34 }
 0x2f2   : > { %v960_v24 = vand.u32 2147483647, %v952_v23 }
 0x2f4   : > { %v980_v35 = vsel %vm492_vm0, %v960_v24, 0.0 }
 0x2f5   : > { %v927_v36 = vpop.f32.mrf.mxu2  ;;  %981 = vadd.xlane.f32.xlu0 %v980_v35 }
 0x2f6   : > { %v945_v37 = vsub.f32 %v821_v26, %v927_v36 }
 0x2f8   : > { %v953_v29 = vsub.f32 %v937_v28, %v945_v37 }
 0x2fa   : > { %v961_v30 = vand.u32 2147483647, %v953_v29 }
 0x2fc   : > { %v983_v31 = vsel %vm492_vm0, %v961_v30, 0.0 }
 0x2fd   : > { %984 = vadd.xlane.f32.xlu1 %v983_v31 }
 0x338   : > { %v964_v38 = vpop.xlane.xlu0 %963 }
 0x340   : > { %v967_v17 = vpop.xlane.xlu0 %966 }
 0x341   : > { %v986_v19 = vadd.f32 %v967_v17, %v964_v38 }
 0x348   : > { %v970_v39 = vpop.xlane.xlu1 %969 }
 0x349   : > { %v987_v41 = vadd.f32 %v986_v19, %v970_v39 }
 0x350   : > { %v973_v20 = vpop.xlane.xlu1 %972 }
 0x351   : > { %v988_v42 = vadd.f32 %v987_v41, %v973_v20 }
 0x358   : > { %v976_v40 = vpop.xlane.xlu2 %975 }
 0x359   : > { %v989_v44 = vadd.f32 %v988_v42, %v976_v40 }
 0x360   : > { %v979_v43 = vpop.xlane.xlu2 %978 }
 0x361   : > { %v990_v46 = vadd.f32 %v989_v44, %v979_v43 }
 0x368   : > { %v982_v45 = vpop.xlane.xlu0 %981 }
 0x369   : > { %v991_v47 = vadd.f32 %v990_v46, %v982_v45 }
 0x370   : > { %v985_v25 = vpop.xlane.xlu1 %984 }
 0x371   : > { %v992_v27 = vadd.f32 %v991_v47, %v985_v25 }
 0x373   : > { %v993_v28 = vrot.slane %v992_v27, 4 }
 0x375   : > { %v994_v48 = vadd.f32 %v993_v28, %v992_v27 }
 0x377   : > { %v995_v49 = vrot.slane %v994_v48, 2 }
 0x379   : > { %v996_v50 = vadd.f32 %v995_v49, %v994_v48 }
 0x37b   : > { %v997_v51 = vrot.slane %v996_v50, 1 }
 0x37d   : > { %v998_v52 = vadd.f32 %v997_v51, %v996_v50 }
 0x37f   : > { %1008 = vst.msk [vmem:[%s451_s0] sm:$0x1] %vm1007_vm2, %v998_v52 }
 0x380 PF: > { %s2063_s13 = sld [smem:[#allocation15_spill]]  ;;  %p19_p4 = scmp.ge.s32.totalorder %s1720_s25, 8  }
 0x381   : > { %s2064_s27 = smov %s1599_s28  ;;  %s2065_s28 = smov %s1603_s29 }
 0x382   : > { %s2067_s30 = smov %s1720_s25  ;;  %21 = sbr.rel (!%p19_p4) target bundleno = 9 (0x9), region = 134 }
 0x386   : > { %s2066_s29 = smov %s2063_s13 }
 0x387   :  { %1058 = vsyncpa [#allocation3], 1 }
 0x388   :  { %1060 = vsyncpa [#allocation3 + $0x1], 1 }
 0x389   :  { %1061 = vsyncpa [#allocation5], 1 }
 0x38a   :  { %1062 = vsyncpa [#allocation8], 1 }

// kernel: lap_loss.8
= control target key start
LH: loop header
LB: loop body
LE: loop exit
PB: predicated region body
PF: predicated region fallthrough
CT: control target
= control target key end

     0   :  { %14 = vsyncpa [#allocation3], 0  ;;  %s831_s27 = smov 0   ;;  %s883_s0 = inlined_call_operand.hbm [shape: f32[4,8], index: 0, kind: input, shape index: {}]   ;;  %s884_s1 = inlined_call_operand.vmem [shape: f32[8,4], index: 1, kind: input, shape index: {}]   ;;  %s885_s2 = inlined_call_operand.vmem [shape: f32[8,4], index: 2, kind: input, shape index: {}]   ;;  %s886_s3 = inlined_call_operand.vmem [shape: f32[4,8], index: 3, kind: input, shape index: {}]   ;;  %s887_s4 = inlined_call_operand.vmem [shape: f32[6,8,8], index: 4, kind: input, shape index: {}]   ;;  %s888_s5 = inlined_call_operand.vmem [shape: f32[6,8,8], index: 5, kind: input, shape index: {}]   ;;  %s889_s6 = inlined_call_operand.vmem [shape: f32[6,4,4], index: 6, kind: output, shape index: {0}]   ;;  %s890_s7 = inlined_call_operand.vmem [shape: f32[6,4,4], index: 7, kind: output, shape index: {1}]   ;;  %s891_s8 = inlined_call_operand.vmem [shape: f32[6,1,1], index: 8, kind: output, shape index: {2}]  }
   0x1 LB: > { %s699_s28 = sadd.s32 4294967295, %s783_s27   ;;  %p701_p0 = scmp.ge.s32.totalorder %s783_s27, 1  ;;  %s783_s27 = sphi %s831_s27, %s20_s27  }
   0x2   : > { %p239_p1 = scmp.lt.s32.totalorder %s783_s27, 7  ;;  %s251_s9 = sshll.u32 %s883_s0, 4  ;;  %s252_s9 = int_to_ptr.hbm [resolvable:$true] %s251_s9 }
   0x3   : > { %p732_p3 = scmp.eq.s32.totalorder %s699_s28, 0  ;;  %s785_s10 = smov [#allocation2]  }
   0x4   : > { %p240_p2 = pnand %p701_p0, %p239_p1  ;;  %s253_s11 = sshll.u32 %s785_s10, 4  ;;  %s254_s11 = int_to_ptr.vmem [resolvable:$true] %s253_s11 }
   0x6   : > { %p728_p4 = pneg %p240_p2  ;;  %289 = sbr.rel (%p240_p2) target bundleno = 684 (0x2ac), region = 44 }
   0x8   : > { %p729_p5 = pnand %p732_p3, %p728_p4 }
   0xa   : > { %731 = dma.hbm_to_vmem [thread:$0]  (!%p729_p5), %s252_s9, 64, %s254_s11, [#allocation3]  }
   0xb   : > { %778 = dma.done.wait (%p732_p3), [#allocation3], 64  }
   0xc   : > { %780 = vsyncadd (%p732_p3), [#allocation3], 4294967232  ;;  %p333_p6 = scmp.lt.s32.totalorder %s699_s28, 5  ;;  %vm358_vm0 = vcmask 64512   ;;  %v355_v0 = vld [vmem:[%s884_s1] sm:$0xff]  ;;  %vm452_vm1 = vcmask 1043456  }
   0xd   : > { %423 = vmatpush.msra.mxu2 %v355_v0  ;;  %377 = vmatpush.msra.mxu0 %v355_v0  ;;  %v354_v5 = vld [vmem:[#allocation2] sm:$0xf]  ;;  %vm561_vm2 = vcmask 27648   ;;  %vm448_vm3 = vcmask 31744   ;;  %vm564_vm4 = vcmask 0  }
   0xe   : > { %s893_s28 = smov (!%p333_p6, %s699_s28), 5  ;;  %v357_v7 = vld [vmem:[%s886_s3] sm:$0xf] }
   0xf   : > { %s706_s12 = sshll.u32 %s893_s28, 3  ;;  %s708_s23 = sshll.u32 %s893_s28, 2  ;;  %v356_v9 = vld [vmem:[%s885_s2] sm:$0xff] }
  0x10   : > { %s340_s15 = scalar_lea.vmem %s888_s5, %s706_s12  ;;  %s336_s18 = scalar_lea.vmem %s887_s4, %s706_s12 }
  0x11   : > { %v353_v1 = vld [vmem:[%s340_s15] sm:$0xff]  ;;  %s344_s26 = scalar_lea.vmem %s889_s6, %s708_s23  ;;  %s348_s11 = scalar_lea.vmem %s890_s7, %s708_s23 }
  0x12   : > { %v352_v2 = vld [vmem:[%s336_s18] sm:$0xff]  ;;  %712 = vmatmul.msk.f32.vlgmr.msra.gmra.mxu2 %vm358_vm0, %v353_v1  ;;  %s351_s14 = scalar_lea.vmem %s891_s8, %s893_s28 }
  0x13   : > { %v548_v3 = vsub.f32 %v352_v2, %v353_v1  ;;  %710 = vmatmul.msk.f32.vlgmr.msra.gmra.mxu0 %vm358_vm0, %v352_v2 }
  0x90   : > { %v379_v4 = vpop.f32.mrf.mxu0 }
  0x91   : > { %400 = vmatpush.msra.mxu1 %v379_v4 }
  0x92   : > { %711 = vmatmul.msk.f32.vlgmr.msra.gmra.mxu1 %vm358_vm0, %v354_v5 }
  0x93   : > { %716 = vmatpush.msk.msrb.mxu1 %vm452_vm1, %v357_v7 }
  0x95   : > { %v425_v6 = vpop.f32.mrf.mxu2 }
  0x96   : > { %443 = vmatpush.msra.mxu3 %v425_v6 }
  0x97   : > { %713 = vmatmul.msk.f32.vlgmr.msra.gmra.mxu3 %vm358_vm0, %v354_v5 }
  0x98   : > { %720 = vmatpush.msk.msrb.mxu3 %vm452_vm1, %v357_v7 }
 0x10f   : > { %v402_v8 = vpop.f32.mrf.mxu1 }
 0x110   : > { %562 = vst.msk [vmem:[%s344_s26] sm:$0xf] %vm561_vm2, %v402_v8  ;;  %714 = vmatpush.msk.msrb.mxu0 %vm452_vm1, %v402_v8 }
 0x111   : > { %715 = vmatmul.msk.f32.vlgmr.msrb.gmra.mxu0 %vm448_vm3, %v356_v9 }
 0x11a   : > { %v445_v10 = vpop.f32.mrf.mxu3 }
 0x11b   : > { %563 = vst.msk [vmem:[%s348_s11] sm:$0xf] %vm561_vm2, %v445_v10  ;;  %718 = vmatpush.msk.msrb.mxu2 %vm452_vm1, %v445_v10 }
 0x11c   : > { %719 = vmatmul.msk.f32.vlgmr.msrb.gmra.mxu2 %vm448_vm3, %v356_v9 }
 0x18e   : > { %v473_v11 = vpop.f32.mrf.mxu0 }
 0x18f   : > { %717 = vmatmul.msk.f32.vlgmr.msrb.gmra.mxu1 %vm448_vm3, %v473_v11 }
 0x19f   : > { %v522_v12 = vpop.f32.mrf.mxu2 }
 0x1a0   : > { %721 = vmatmul.msk.f32.vlgmr.msrb.gmra.mxu3 %vm448_vm3, %v522_v12 }
 0x20c   : > { %v499_v13 = vpop.f32.mrf.mxu1 }
 0x223   : > { %v545_v14 = vpop.f32.mrf.mxu3 }
 0x224   : > { %v549_v15 = vsub.f32 %v499_v13, %v545_v14 }
 0x226   : > { %v550_v16 = vsub.f32 %v548_v3, %v549_v15 }
 0x228   : > { %v551_v17 = vand.u32 2147483647, %v550_v16 }
 0x22a   : > { %v552_v18 = vsel %vm358_vm0, %v551_v17, 0.0 }
 0x22b   : > { %553 = vadd.xlane.f32.xlu0 %v552_v18 }
 0x29e   : > { %v554_v19 = vpop.xlane.xlu0 %553 }
 0x29f   : > { %v555_v20 = vrot.slane %v554_v19, 4 }
 0x2a1   : > { %v556_v21 = vadd.f32 %v555_v20, %v554_v19 }
 0x2a3   : > { %v557_v22 = vrot.slane %v556_v21, 2 }
 0x2a5   : > { %v558_v23 = vadd.f32 %v557_v22, %v556_v21 }
 0x2a7   : > { %v559_v24 = vrot.slane %v558_v23, 1 }
 0x2a9   : > { %v560_v25 = vadd.f32 %v559_v24, %v558_v23 }
 0x2ab   : > { %565 = vst.msk [vmem:[%s351_s14] sm:$0x1] %vm564_vm4, %v560_v25 }
 0x2ac PF: > { %s20_s27 = sadd.s32 1, %s783_s27  }
 0x2ad   : > { %p17_p7 = scmp.ge.s32.totalorder %s20_s27, 8  }
 0x2af   :  { %19 = sbr.rel (!%p17_p7) target bundleno = 1 (0x1), region = 106 }
 0x2b4   :  { %611 = vsyncpa [#allocation3], 1 }
 0x2b5   :  { %613 = vsyncpa [#allocation3 + $0x1], 1 }

// kernel: lap_loss.9
= control target key start
LH: loop header
LB: loop body
LE: loop exit
PB: predicated region body
PF: predicated region fallthrough
CT: control target
= control target key end

     0   :  { %s1080_s0 = inlined_call_operand.vmem [shape: f32[2,4], index: 0, kind: input, shape index: {}]   ;;  %s1081_s1 = inlined_call_operand.vmem [shape: f32[4,2], index: 1, kind: input, shape index: {}]   ;;  %s1082_s2 = inlined_call_operand.vmem [shape: f32[4,2], index: 2, kind: input, shape index: {}]   ;;  %s1083_s3 = inlined_call_operand.vmem [shape: f32[2,4], index: 3, kind: input, shape index: {}]   ;;  %s1084_s4 = inlined_call_operand.vmem [shape: f32[6,4,4], index: 4, kind: input, shape index: {}]   ;;  %s1085_s5 = inlined_call_operand.vmem [shape: f32[6,4,4], index: 5, kind: input, shape index: {}]   ;;  %s1086_s6 = inlined_call_operand.hbm [shape: f32[6,2,2], index: 6, kind: output, shape index: {0}]   ;;  %s1087_s7 = inlined_call_operand.hbm [shape: f32[6,2,2], index: 7, kind: output, shape index: {1}]   ;;  %s1088_s8 = inlined_call_operand.vmem [shape: f32[6,1,1], index: 8, kind: output, shape index: {2}]  }
   0x1   :  { %1089 = sst [smem:[#allocation8_spill]] %s1080_s0 }
   0x2   :  { %1090 = sst [smem:[#allocation9_spill]] %s1081_s1 }
   0x3   :  { %1091 = sst [smem:[#allocation10_spill]] %s1082_s2 }
   0x4   :  { %14 = vsyncpa [#allocation3], 0 }
   0x5   :  { %16 = vsyncpa [#allocation3 + $0x1], 0 }
   0x6   :  { %17 = vsyncpa [#allocation5], 0 }
   0x7   :  { %19 = vsyncpa [#allocation5 + $0x1], 0  ;;  %s942_s27 = smov 0   ;;  %s944_s28 = smov 0  }
   0x8   :  { %s946_s29 = smov 0   ;;  %s948_s30 = smov 0  }
   0x9 LB: > { %s963_s9 = sadd.s32 4294967295, %s895_s30   ;;  %s727_s10 = sadd.s32 4294967294, %s895_s30   ;;  %s895_s30 = sphi %s948_s30, %s1100_s30   ;;  %s891_s29 = sphi %s946_s29, %s1099_s29   ;;  %s887_s28 = sphi %s944_s28, %s1098_s28   ;;  %s883_s27 = sphi %s942_s27, %s1097_s27  }
   0xa   : > { %s967_s11 = sadd.s32 1, %s895_s30   ;;  %s168_s12 = sadd.s32 1, %s891_s29 }
   0xb   : > { %s165_s13 = ssub.s32 %s895_s30, %s967_s11  ;;  %p178_p0 = scmp.ne.s32.totalorder %s891_s29, %s887_s28 }
   0xc   : > { %p166_p1 = scmp.eq.s32.totalorder %s165_s13, 0  ;;  %p179_p2 = scmp.eq.s32.totalorder %s963_s9, 5 }
   0xd   : > { %p184_p3 = scmp.ne.s32.totalorder %s887_s28, %s883_s27  ;;  %p185_p4 = scmp.eq.s32.totalorder %s727_s10, 5 }
   0xe   : > { %s978_s14 = scalar_select %p166_p1, %s891_s29, %s168_s12  }
   0xf   : > { %p980_p5 = por %p179_p2, %p178_p0  ;;  %p984_p6 = por %p185_p4, %p184_p3 }
  0x10   : > { %p730_p7 = scmp.ge.s32.totalorder %s895_s30, 1  ;;  %p281_p8 = scmp.lt.s32.totalorder %s895_s30, 7 }
  0x12   : > { %p282_p9 = pnand %p730_p7, %p281_p8 }
  0x13   : > { %s1094_s1 = sld [smem:[#allocation9_spill]] (!%p282_p9)  ;;  %p326_p10 = scmp.lt.s32.totalorder (!%p282_p9), %s963_s9, 5 }
  0x14   : > { %285 = sbr.rel (%p282_p9) target bundleno = 697 (0x2b9), region = 44  ;;  %s1095_s0 = sld [smem:[#allocation8_spill]] (!%p282_p9) }
  0x15   : > { %s1017_s18 = sand.u32 (!%p282_p9), 1, %s887_s28   ;;  %s1096_s2 = sld [smem:[#allocation10_spill]] (!%p282_p9) }
  0x16   : > { %s753_s25 = sshll.u32 (!%p282_p9), %s963_s9, 1  ;;  %s821_s10 = scalar_lea.hbm (!%p282_p9), %s1086_s6, 12 }
  0x17   : > { %s582_s12 = scalar_lea.hbm (!%p282_p9), %s1086_s6, %s753_s25 }
  0x18   : > { %s586_s22 = sshll.u32 (!%p282_p9), %s582_s12, 4  ;;  %s587_s22 = int_to_ptr.hbm [resolvable:$true] %s586_s22 }
  0x19   : > { %v340_v0 = vld [vmem:[%s1094_s1] sm:$0xf]  ;;  %vm347_vm0 = vcmask 1043456   ;;  %s997_s19 = scalar_select %p326_p10, %s963_s9, 5  ;;  %vm343_vm1 = vcmask 31744   ;;  %vm447_vm2 = vcmask 1041408  }
  0x1a   : > { %739 = vmatpush.msk.msra.mxu2 %vm347_vm0, %v340_v0  ;;  %735 = vmatpush.msk.msra.mxu0 %vm347_vm0, %v340_v0  ;;  %v339_v5 = vld [vmem:[%s1095_s0] sm:$0x3]  ;;  %vm558_vm3 = vcmask 9216   ;;  %vm443_vm4 = vcmask 15360   ;;  %vm547_vm5 = vcmask 27648   ;;  %s564_s0 = scalar_lea.sflag [#allocation3], %s1017_s18 }
  0x1b   : > { %s733_s20 = sshll.u32 %s997_s19, 2  ;;  %v342_v7 = vld [vmem:[%s1083_s3] sm:$0x3]  ;;  %s815_s1 = sshra.s32 %s587_s22, 4  ;;  %s816_s1 = int_to_ptr.hbm [resolvable:$true] %s815_s1 }
  0x1c   : > { %s333_s23 = scalar_lea.vmem %s1085_s5, %s733_s20  ;;  %s329_s26 = scalar_lea.vmem %s1084_s4, %s733_s20  ;;  %v341_v9 = vld [vmem:[%s1096_s2] sm:$0xf] }
  0x1d   : > { %v338_v1 = vld [vmem:[%s333_s23] sm:$0xf]  ;;  %s731_s20 = sshll.u32 %s1017_s18, 1  ;;  %s817_s2 = scalar_lea.hbm %s816_s1, 2 }
  0x1e   : > { %v337_v2 = vld [vmem:[%s329_s26] sm:$0xf]  ;;  %740 = vmatmul.msk.f32.vlgmr.msra.gmra.mxu2 %vm343_vm1, %v338_v1  ;;  %s313_s23 = scalar_lea.vmem [#allocation2], %s731_s20  ;;  %s1024_s24 = scalar_lea.vmem [#allocation4], %s731_s20 }
  0x1f   : > { %736 = vmatmul.msk.f32.vlgmr.msra.gmra.mxu0 %vm343_vm1, %v337_v2  ;;  %v543_v3 = vsub.f32 %v337_v2, %v338_v1  ;;  %s596_s20 = scalar_lea.hbm %s1087_s7, %s753_s25  ;;  %s584_s21 = sshll.u32 %s313_s23, 4  ;;  %s585_s21 = int_to_ptr.vmem [resolvable:$true] %s584_s21 }
  0x20   : > { %p818_p11 = scmp.ne.s32.totalorder %s816_s1, %s817_s2  ;;  %p822_p0 = scmp.lt.s32.totalorder %s816_s1, %s1086_s6 }
  0x21   : > { %p823_p1 = scmp.lt.s32.totalorder %s821_s10, %s817_s2 }
  0x22   : > { %p819_p12 = pnand %p818_p11, %p980_p5 }
  0x23   : > { %p824_p2 = por %p823_p1, %p822_p0 }
  0x24   : > { %p820_p13 = pneg %p819_p12 }
  0x26   : > { %p825_p3 = pnand %p824_p2, %p820_p13 }
  0x9c   : > { %v368_v4 = vpop.f32.mrf.mxu0 }
  0x9d   : > { %737 = vmatpush.msk.msra.mxu1 %vm347_vm0, %v368_v4 }
  0x9e   : > { %738 = vmatmul.msk.f32.vlgmr.msra.gmra.mxu1 %vm343_vm1, %v339_v5 }
  0x9f   : > { %745 = vmatpush.msk.msrb.mxu1 %vm447_vm2, %v342_v7 }
  0xa1   : > { %v417_v6 = vpop.f32.mrf.mxu2 }
  0xa2   : > { %741 = vmatpush.msk.msra.mxu3 %vm347_vm0, %v417_v6 }
  0xa3   : > { %742 = vmatmul.msk.f32.vlgmr.msra.gmra.mxu3 %vm343_vm1, %v339_v5 }
  0xa4   : > { %749 = vmatpush.msk.msrb.mxu3 %vm447_vm2, %v342_v7 }
 0x11b   : > { %v394_v8 = vpop.f32.mrf.mxu1 }
 0x11c   : > { %559 = vst.msk [vmem:[%s313_s23] sm:$0x3] %vm558_vm3, %v394_v8  ;;  %743 = vmatpush.msk.msrb.mxu0 %vm447_vm2, %v394_v8 }
 0x11d   : > { %744 = vmatmul.msk.f32.vlgmr.msrb.gmra.mxu0 %vm443_vm4, %v341_v9 }
 0x126   : > { %v440_v10 = vpop.f32.mrf.mxu3 }
 0x127   : > { %560 = vst.msk [vmem:[%s1024_s24] sm:$0x3] %vm558_vm3, %v440_v10  ;;  %747 = vmatpush.msk.msrb.mxu2 %vm447_vm2, %v440_v10 }
 0x128   : > { %748 = vmatmul.msk.f32.vlgmr.msrb.gmra.mxu2 %vm443_vm4, %v341_v9 }
 0x19a   : > { %v468_v11 = vpop.f32.mrf.mxu0 }
 0x19b   : > { %746 = vmatmul.msk.f32.vlgmr.msrb.gmra.mxu1 %vm443_vm4, %v468_v11 }
 0x1ab   : > { %v517_v12 = vpop.f32.mrf.mxu2 }
 0x1ac   : > { %750 = vmatmul.msk.f32.vlgmr.msrb.gmra.mxu3 %vm443_vm4, %v517_v12 }
 0x218   : > { %v494_v13 = vpop.f32.mrf.mxu1 }
 0x22f   : > { %v540_v14 = vpop.f32.mrf.mxu3 }
 0x230   : > { %v544_v15 = vsub.f32 %v494_v13, %v540_v14 }
 0x232   : > { %v545_v16 = vsub.f32 %v543_v3, %v544_v15 }
 0x234   : > { %v546_v17 = vand.u32 2147483647, %v545_v16 }
 0x236   : > { %v548_v18 = vsel %vm547_vm5, %v546_v17, 0.0 }
 0x237   : > { %549 = vadd.xlane.f32.xlu0 %v548_v18 }
 0x238   : > { %828 = shalt.err (!%p825_p3)
}
 0x239   : > { %757 = dma.vmem_to_hbm [thread:$0]  (%p980_p5), %s585_s21, 32, %s587_s22, %s564_s0  }
 0x23a   : > { %s598_s23 = sshll.u32 %s1024_s24, 4  ;;  %s600_s12 = sshll.u32 %s596_s20, 4  ;;  %s599_s23 = int_to_ptr.vmem [resolvable:$true] %s598_s23  ;;  %s601_s12 = int_to_ptr.hbm [resolvable:$true] %s600_s12 }
 0x23b   : > { %s569_s17 = scalar_lea.sflag [#allocation5], %s1017_s18  ;;  %s843_s9 = sshra.s32 %s601_s12, 4  ;;  %s844_s9 = int_to_ptr.hbm [resolvable:$true] %s843_s9 }
 0x23c   : > { %s845_s26 = scalar_lea.hbm %s844_s9, 2  ;;  %s849_s10 = scalar_lea.hbm %s1087_s7, 12 }
 0x23d   : > { %p846_p4 = scmp.ne.s32.totalorder %s844_s9, %s845_s26  ;;  %p850_p9 = scmp.lt.s32.totalorder %s844_s9, %s1087_s7 }
 0x23e   : > { %p851_p10 = scmp.lt.s32.totalorder %s849_s10, %s845_s26 }
 0x23f   : > { %p847_p7 = pnand %p846_p4, %p980_p5 }
 0x240   : > { %p852_p11 = por %p851_p10, %p850_p9 }
 0x241   : > { %p848_p8 = pneg %p847_p7 }
 0x243   : > { %p853_p12 = pnand %p852_p11, %p848_p8 }
 0x245   : > { %856 = shalt.err (!%p853_p12)
}
 0x246   : > { %758 = dma.vmem_to_hbm [thread:$0]  (%p980_p5), %s599_s23, 32, %s601_s12, %s569_s17   ;;  %vm561_vm6 = vcmask 0  }
 0x247   : > { %s336_s24 = scalar_lea.vmem %s1088_s8, %s997_s19 }
 0x2aa   : > { %v550_v19 = vpop.xlane.xlu0 %549 }
 0x2ab   : > { %v551_v20 = vsel %vm347_vm0, %v550_v19, 0.0 }
 0x2ac   : > { %v552_v21 = vrot.slane %v551_v20, 4 }
 0x2ae   : > { %v553_v22 = vadd.f32 %v552_v21, %v551_v20 }
 0x2b0   : > { %v554_v23 = vrot.slane %v553_v22, 2 }
 0x2b2   : > { %v555_v24 = vadd.f32 %v554_v23, %v553_v22 }
 0x2b4   : > { %v556_v25 = vrot.slane %v555_v24, 1 }
 0x2b6   : > { %v557_v26 = vadd.f32 %v556_v25, %v555_v24 }
 0x2b8   : > { %562 = vst.msk [vmem:[%s336_s24] sm:$0x1] %vm561_vm6, %v557_v26 }
 0x2b9 PF: > { %p768_p5 = scmp.ge.s32.totalorder %s895_s30, 2  ;;  %s615_s15 = sand.u32 1, %s883_s27  }
 0x2ba   : > { %s616_s20 = scalar_lea.sflag [#allocation3], %s615_s15 }
 0x2bb   : > { %p762_p13 = pnand %p768_p5, %p984_p6 }
 0x2bd   : > { %p763_p0 = pneg %p762_p13 }
 0x2bf   : > { %874 = dma.done.wait (%p763_p0), %s616_s20, 32  }
 0x2c0   : > { %876 = vsyncadd (%p763_p0), %s616_s20, 4294967264  ;;  %s626_s21 = scalar_lea.sflag [#allocation5], %s615_s15 }
 0x2c1   : > { %878 = dma.done.wait (%p763_p0), %s626_s21, 32  }
 0x2c2   : > { %880 = vsyncadd (%p763_p0), %s626_s21, 4294967264  ;;  %p22_p1 = scmp.ge.s32.totalorder %s967_s11, 8   ;;  %s1097_s27 = smov %s887_s28 }
 0x2c3   : > { %s1098_s28 = smov %s891_s29  ;;  %s1099_s29 = smov %s978_s14 }
 0x2c4   : > { %s1100_s30 = smov %s967_s11  ;;  %24 = sbr.rel (!%p22_p1) target bundleno = 9 (0x9), region = 111 }
 0x2c9   :  { %638 = vsyncpa [#allocation3], 1 }
 0x2ca   :  { %640 = vsyncpa [#allocation3 + $0x1], 1 }
 0x2cb   :  { %641 = vsyncpa [#allocation5], 1 }
 0x2cc   :  { %643 = vsyncpa [#allocation5 + $0x1], 1 }

</bundles_post_ra>
